<compile_context>
chip_gen: v5e
topology: v5e:2x2
jax: 0.10.0
libtpu: 0.0.40
codegen_flags: <defaults>
</compile_context>

<pallas_src>
import functools

import jax
import jax.numpy as jnp
from jax.experimental import pallas as pl
from jax.experimental.pallas import tpu as pltpu

EPS = 1e-5  # eps of BatchNorm2d and GroupNorm
HIGHEST = jax.lax.Precision.HIGHEST


def _vmem_limit_bytes():
    """3/4 of physical VMEM: ~48 MiB on v7x (64 MiB), ~96 MiB on v5e/v6e (128 MiB)."""
    try:
        cap = int(pltpu.get_tpu_info().vmem_capacity_bytes)
    except Exception:
        cap = 64 * 1024 * 1024  # conservative (v7x-sized) fallback
    return min((cap * 3) // 4, 112 * 1024 * 1024)


def _x_block_spec(block_shape, index_map, deep_buffering):
    """BlockSpec for the streamed x block; 3-deep pipelining when VMEM budget allows."""
    if deep_buffering:
        try:
            return pl.BlockSpec(block_shape, index_map, pipeline_mode=pl.Buffered(3))
        except Exception:  # older jax without pipeline_mode / Buffered -> default (2)
            pass
    return pl.BlockSpec(block_shape, index_map)


def bn_stats_kernel(x_ref, gram_ref, sum_ref):
    """Accumulate channel Gram matrix G += x^T x and channel column-sum s += 1^T x.

    Both land on the MXU with f32 accumulation; the host recovers the BatchNorm batch
    statistics of y = x @ w1t as  sum_y = s @ w1t,  sq_y = colsum((G @ w1t) * w1t)."""
    @pl.when(pl.program_id(1) == 0)
    def _():
        gram_ref[...] = jnp.zeros_like(gram_ref)
        sum_ref[...] = jnp.zeros_like(sum_ref)

    H, W, Cp = x_ref.shape
    x2 = x_ref[...].reshape(H * W, Cp)
    # Transposed-LHS contraction (dim 0 on both sides): no explicit transpose copy.
    gram_ref[...] += jax.lax.dot_general(
        x2, x2, (((0,), (0,)), ((), ())), preferred_element_type=jnp.float32)
    ones = jnp.ones((1, H * W), dtype=x2.dtype)
    sum_ref[...] += jnp.dot(ones, x2, preferred_element_type=jnp.float32)


def cls_head_main_kernel(x_ref, w1t_ref, bn_shift_ref, wk_ref, wfc_ref, o_ref):
    """Per-sample: 1x1 conv (BN scale pre-folded into the weight) -> +shift -> ReLU
    -> depthwise (K=H,1) conv -> GroupNorm -> sigmoid gate (fc weight folded in)
    -> weighted reduction over W."""
    H, W, Cp = x_ref.shape

    x2 = x_ref[...].reshape(H * W, Cp)
    # BN scale folded into w1t; conv bias b1 cancels under the BN mean subtraction.
    yw = jnp.dot(x2, w1t_ref[...], preferred_element_type=jnp.float32)   # (H*W, Cp) f32
    y2 = jnp.maximum(yw + bn_shift_ref[...], 0.0)
    y3 = y2.reshape(H, W, Cp)                 # W % 8 == 0 -> tile-preserving reshape

    # Depthwise (K=H, 1) valid conv: height collapses to 1 (bias bk cancels in GN).
    wgt = jnp.sum(y3 * wk_ref[...][:, None, :], axis=0)                  # (W, Cp)

    # GroupNorm(C, C): per-channel statistics over W (one-pass).
    gm = jnp.mean(wgt, axis=0, keepdims=True)                            # (1, Cp)
    gv = jnp.maximum(jnp.mean(wgt * wgt, axis=0, keepdims=True) - gm * gm, 0.0)
    gate = jax.nn.sigmoid((wgt - gm) * jax.lax.rsqrt(gv + EPS))          # (W, Cp)

    # Fold the fc (Linear W->1) weight into the gate; never materialize z = gate*y.
    g = gate * wfc_ref[...]                                              # (W, Cp)
    o_ref[...] = jnp.sum(y3 * g[None, :, :], axis=1)                     # (H, Cp)


def cls_head_forward(x_nchw, params, *, matmul_dtype=jnp.bfloat16):
    """x_nchw: (N, C, H, W) float32; returns (N, C, H, 1) like the PyTorch module.

    matmul_dtype=jnp.bfloat16 (default) halves the dominant HBM read and matches the
    native MXU dtype on v6e/v7x; all normalization math stays f32.  Use
    matmul_dtype=jnp.float32 for a near-exact path."""
    w1, b1, wk, bk, wfc, bfc = (params[k] for k in ("w1", "b1", "wk", "bk", "wfc", "bfc"))
    del b1, bk  # conv biases cancel exactly under BN / GN mean subtraction
    N, C, H, W = x_nchw.shape
    K = wk.shape[1]
    assert K == H, "conv_kx1 kernel height must equal H (50 in the original module)"
    assert W % 8 == 0, "W must be a multiple of 8 for tile-preserving in-kernel reshapes"

    # Lane-dense channel padding (100 -> 128 at real shapes).  Do NOT pad to 256 to
    # "fill" the 2x256 v6e/v7x MXU: both passes are HBM/VALU-bound, so that would only
    # double the x HBM read and VMEM footprint for zero gain.
    Cp = ((C + 127) // 128) * 128
    assert Cp % 128 == 0

    vmem_limit = _vmem_limit_bytes()
    deep = vmem_limit >= 80 * 1024 * 1024  # deeper x buffering only on 128-MiB chips

    # NCHW -> NHWC, zero-pad channels, cast for the MXU / HBM read.  Under jit this is a
    # single fused pass writing matmul_dtype (see TODO at top about emitting NHWC).
    x_nhwc = jnp.transpose(x_nchw, (0, 2, 3, 1)).astype(jnp.float32)
    x_nhwc = jnp.pad(x_nhwc, ((0, 0), (0, 0), (0, 0), (0, Cp - C))).astype(matmul_dtype)

    w1t_f32 = jnp.zeros((Cp, Cp), jnp.float32).at[:C, :C].set(jnp.transpose(w1))
    wk_p = jnp.zeros((K, Cp), jnp.float32).at[:, :C].set(jnp.transpose(wk))
    wfc_b = jnp.broadcast_to(wfc.astype(jnp.float32)[:, None], (W, Cp))  # lane-dense

    # ---- Pass 1: Gram / column-sum accumulation for BatchNorm batch statistics ----
    # Leading "parallel" axis splits the accumulation across v7x's two TensorCores
    # (partials reduced on the host); trailing "arbitrary" axis walks the batch chunk.
    split = 2 if (N >= 2 and N % 2 == 0) else 1
    n_chunk = N // split
    gram_p, sum_p = pl.pallas_call(
        bn_stats_kernel,
        out_shape=(jax.ShapeDtypeStruct((split, Cp, Cp), jnp.float32),
                   jax.ShapeDtypeStruct((split, 1, Cp), jnp.float32)),
        grid=(split, n_chunk),
        in_specs=[
            _x_block_spec((None, H, W, Cp),
                          lambda s, n: (s * n_chunk + n, 0, 0, 0), deep),
        ],
        out_specs=(
            pl.BlockSpec((None, Cp, Cp), lambda s, n: (s, 0, 0)),
            pl.BlockSpec((None, 1, Cp), lambda s, n: (s, 0, 0)),
        ),
        compiler_params=pltpu.CompilerParams(
            dimension_semantics=("parallel", "arbitrary"),
            vmem_limit_bytes=vmem_limit),
    )(x_nhwc)
    gram = jnp.sum(gram_p, axis=0)                                       # (Cp, Cp)
    ssum = jnp.sum(sum_p, axis=0)                                        # (1, Cp)

    # Host epilogue (f32, tiny O(Cp^3)): per-channel BN batch stats of y = x @ w1t.
    m = jnp.float32(N * H * W)
    sum_y = jnp.matmul(ssum, w1t_f32, precision=HIGHEST)                 # (1, Cp)
    gw = jnp.matmul(gram, w1t_f32, precision=HIGHEST)                    # (Cp, Cp)
    sq_y = jnp.sum(gw * w1t_f32, axis=0, keepdims=True)                  # (1, Cp)
    mu = sum_y / m
    var = jnp.maximum(sq_y / m - mu * mu, 0.0)
    rstd = jax.lax.rsqrt(var + EPS)          # BN gamma = 1
    bn_shift = -mu * rstd                    # BN beta = 0; conv bias b1 cancels exactly
    # Fold the BN scale into the 1x1-conv weight (exact: per-output-channel scaling).
    w1t_main = (w1t_f32 * rstd).astype(matmul_dtype)

    # ---- Pass 2: per-sample main pass.  Batch axis "parallel": v7x dual-TC needs
    # N >= 2 (ideally even) to use both TensorCores. ----
    out_nhc = pl.pallas_call(
        cls_head_main_kernel,
        out_shape=jax.ShapeDtypeStruct((N, H, Cp), jnp.float32),
        grid=(N,),
        in_specs=[
            _x_block_spec((None, H, W, Cp), lambda n: (n, 0, 0, 0), deep),
            pl.BlockSpec((Cp, Cp), lambda n: (0, 0)),
            pl.BlockSpec((1, Cp), lambda n: (0, 0)),
            pl.BlockSpec((K, Cp), lambda n: (0, 0)),
            pl.BlockSpec((W, Cp), lambda n: (0, 0)),
        ],
        out_specs=pl.BlockSpec((None, H, Cp), lambda n: (n, 0, 0)),
        compiler_params=pltpu.CompilerParams(
            dimension_semantics=("parallel",),
            vmem_limit_bytes=vmem_limit),
    )(x_nhwc, w1t_main, bn_shift, wk_p, wfc_b)

    # Slice off padded channels, back to PyTorch layout (N, C, H, 1), add fc bias.
    return jnp.transpose(out_nhc[:, :, :C], (0, 2, 1))[..., None] + bfc[0]


def init_params(key, in_chan, hid_dim, out_dim, k_h):
    """Deterministic synthetic init mirroring the module's _initialize_weights
    (kaiming_normal fan_out w/ relu gain; all biases / norm affine = identity)."""
    k1, k2, k3 = jax.random.split(key, 3)
    w1 = jax.random.normal(k1, (in_chan, in_chan), jnp.float32) * jnp.sqrt(2.0 / in_chan)
    b1 = jnp.zeros((in_chan,), jnp.float32)
    wk = jax.random.normal(k2, (in_chan, k_h), jnp.float32) * jnp.sqrt(2.0 / (in_chan * k_h))
    bk = jnp.zeros((in_chan,), jnp.float32)
    wfc = jax.random.normal(k3, (hid_dim,), jnp.float32) * jnp.sqrt(2.0 / out_dim)
    bfc = jnp.zeros((1,), jnp.float32)
    return dict(w1=w1, b1=b1, wk=wk, bk=bk, wfc=wfc, bfc=bfc)


def cls_head_ref(x_nchw, params):
    """Pure-JAX f32 reference in NCHW mirroring the PyTorch forward (train mode)."""
    w1, b1, wk, bk, wfc, bfc = (params[k] for k in ("w1", "b1", "wk", "bk", "wfc", "bfc"))
    y = jnp.einsum("oc,nchw->nohw", w1, x_nchw, precision=HIGHEST) + b1[None, :, None, None]
    mu = jnp.mean(y, axis=(0, 2, 3), keepdims=True)
    var = jnp.mean((y - mu) ** 2, axis=(0, 2, 3), keepdims=True)
    y = (y - mu) / jnp.sqrt(var + EPS)
    y = jnp.maximum(y, 0.0)
    w = jnp.einsum("ck,nckw->ncw", wk, y, precision=HIGHEST)[:, :, None, :] \
        + bk[None, :, None, None]
    gm = jnp.mean(w, axis=(2, 3), keepdims=True)
    gv = jnp.mean((w - gm) ** 2, axis=(2, 3), keepdims=True)
    w = jax.nn.sigmoid((w - gm) / jnp.sqrt(gv + EPS))
    z = w * y
    return jnp.einsum("nchw,w->nch", z, wfc, precision=HIGHEST)[..., None] + bfc[0]


def cls_head_kernel_numerics_ref(x_nchw, params, matmul_dtype):
    """Pure-JAX mirror of the kernel's numerics (quantized matmul inputs, f32 stats and
    norm math, BN scale folded into the quantized 1x1 weight) for a tight low-precision
    check, per the review's correctness feedback."""
    w1, b1, wk, bk, wfc, bfc = (params[k] for k in ("w1", "b1", "wk", "bk", "wfc", "bfc"))
    del b1, bk
    xd = x_nchw.astype(matmul_dtype).astype(jnp.float32)
    # BN batch stats from the *unscaled* f32 weight (matches the Gram-matrix path).
    ys = jnp.einsum("oc,nchw->nohw", w1, xd, precision=HIGHEST)
    mu = jnp.mean(ys, axis=(0, 2, 3), keepdims=True)
    var = jnp.maximum(jnp.mean(ys * ys, axis=(0, 2, 3), keepdims=True) - mu * mu, 0.0)
    rstd = jax.lax.rsqrt(var + EPS)
    # Pass 2: BN scale folded into the quantized matmul weight, shift added afterwards.
    w1s = (w1 * rstd[0, :, 0, 0][:, None]).astype(matmul_dtype).astype(jnp.float32)
    y = jnp.maximum(jnp.einsum("oc,nchw->nohw", w1s, xd, precision=HIGHEST) - mu * rstd, 0.0)
    wgt = jnp.einsum("ck,nckw->ncw", wk, y, precision=HIGHEST)[:, :, None, :]
    gm = jnp.mean(wgt, axis=(2, 3), keepdims=True)
    gv = jnp.maximum(jnp.mean(wgt * wgt, axis=(2, 3), keepdims=True) - gm * gm, 0.0)
    gate = jax.nn.sigmoid((wgt - gm) * jax.lax.rsqrt(gv + EPS))
    z = gate * y
    return jnp.einsum("nchw,w->nch", z, wfc, precision=HIGHEST)[..., None] + bfc[0]


if __name__ == "__main__":
    # Small analogue of the original (in_chan=100, H=50, W=hid_dim=256, out_dim=1).
    N, C, H, W = 2, 8, 16, 32
    K = H  # conv_kx1 kernel height == H

    key = jax.random.PRNGKey(0)
    kp, kx = jax.random.split(key)
    params = init_params(kp, in_chan=C, hid_dim=W, out_dim=1, k_h=K)
    x = jax.random.normal(kx, (N, C, H, W), jnp.float32)

    ref = cls_head_ref(x, params)

    # f32 path: strict check against the PyTorch-mirror reference.
    fwd_f32 = jax.jit(functools.partial(cls_head_forward, matmul_dtype=jnp.float32))
    out_f32 = jax.block_until_ready(fwd_f32(x, params))
    assert out_f32.shape == (N, C, H, 1), out_f32.shape
    assert jnp.allclose(out_f32, ref, atol=2e-3, rtol=2e-3), \
        float(jnp.max(jnp.abs(out_f32 - ref)))

    # Default bf16-matmul path: tight check against a reference that mirrors the
    # kernel's numerics, plus a looser sanity check against the full-f32 reference.
    fwd = jax.jit(cls_head_forward)
    out = jax.block_until_ready(fwd(x, params))
    assert out.shape == (N, C, H, 1), out.shape
    ref_bf16 = cls_head_kernel_numerics_ref(x, params, jnp.bfloat16)
    assert bool(jnp.all(jnp.isfinite(out)))
    assert jnp.allclose(out, ref_bf16, atol=2e-2, rtol=2e-2), \
        float(jnp.max(jnp.abs(out - ref_bf16)))
    assert jnp.allclose(out, ref, atol=0.25, rtol=0.25), \
        float(jnp.max(jnp.abs(out - ref)))

    print("KERNEL_OK")
</pallas_src>

<mosaic_0001>
module attributes {stable_mosaic.version = 11 : i64} {
  func.func @bn_stats_kernel(%arg0: i32, %arg1: i32, %arg2: memref<1x16x32x128xf32, #tpu.memory_space<vmem>>, %arg3: memref<1x128x128xf32, #tpu.memory_space<vmem>>, %arg4: memref<1x1x128xf32, #tpu.memory_space<vmem>>) attributes {dimension_semantics = [#tpu.dimension_semantics<parallel>, #tpu.dimension_semantics<arbitrary>], iteration_bounds = array<i64: 2, 1>, scalar_prefetch = 0 : i64, scratch_operands = 0 : i64, tpu.core_type = #tpu.core_type<tc>, window_params = [{transform_indices = @transform_0, window_bounds = array<i64: 1, 16, 32, 128>}, {transform_indices = @transform_1, window_bounds = array<i64: 1, 128, 128>}, {transform_indices = @transform_2, window_bounds = array<i64: 1, 1, 128>}]} {
    %c0_i32 = arith.constant 0 : i32
    %0 = arith.cmpi eq, %arg1, %c0_i32 : i32
    %1 = arith.extui %0 : i1 to i32
    %c0_i32_0 = arith.constant 0 : i32
    %2 = arith.cmpi ne, %1, %c0_i32_0 : i32
    scf.if %2 {
      %cst_18 = arith.constant 0.000000e+00 : f32
      %21 = vector.broadcast %cst_18 : f32 to vector<128x128xf32>
      %c0_19 = arith.constant 0 : index
      %c0_20 = arith.constant 0 : index
      %c0_21 = arith.constant 0 : index
      %22 = vector.load %arg3[%c0_19, %c0_20, %c0_21] : memref<1x128x128xf32, #tpu.memory_space<vmem>>, vector<1x128x128xf32>
      %23 = vector.shape_cast %22 : vector<1x128x128xf32> to vector<128x128xf32>
      %24 = vector.shape_cast %21 : vector<128x128xf32> to vector<1x128x128xf32>
      tpu.vector_store %arg3[%c0_19, %c0_20, %c0_21], %24 {strides = array<i32>} : memref<1x128x128xf32, #tpu.memory_space<vmem>>, vector<1x128x128xf32>,
      %cst_22 = arith.constant 0.000000e+00 : f32
      %25 = vector.broadcast %cst_22 : f32 to vector<1x128xf32>
      %c0_23 = arith.constant 0 : index
      %c0_24 = arith.constant 0 : index
      %c0_25 = arith.constant 0 : index
      %26 = vector.load %arg4[%c0_23, %c0_24, %c0_25] : memref<1x1x128xf32, #tpu.memory_space<vmem>>, vector<1x1x128xf32>
      %27 = vector.shape_cast %26 : vector<1x1x128xf32> to vector<1x128xf32>
      %28 = vector.shape_cast %25 : vector<1x128xf32> to vector<1x1x128xf32>
      tpu.vector_store %arg4[%c0_23, %c0_24, %c0_25], %28 {strides = array<i32>} : memref<1x1x128xf32, #tpu.memory_space<vmem>>, vector<1x1x128xf32>,
    } else {
    }
    %c0 = arith.constant 0 : index
    %c0_1 = arith.constant 0 : index
    %c0_2 = arith.constant 0 : index
    %c0_3 = arith.constant 0 : index
    %3 = vector.load %arg2[%c0, %c0_1, %c0_2, %c0_3] : memref<1x16x32x128xf32, #tpu.memory_space<vmem>>, vector<1x16x32x128xf32>
    %4 = vector.shape_cast %3 : vector<1x16x32x128xf32> to vector<16x32x128xf32>
    %5 = vector.shape_cast %4 : vector<16x32x128xf32> to vector<512x128xf32>
    %c0_4 = arith.constant 0 : index
    %c0_5 = arith.constant 0 : index
    %c0_6 = arith.constant 0 : index
    %6 = vector.load %arg3[%c0_4, %c0_5, %c0_6] : memref<1x128x128xf32, #tpu.memory_space<vmem>>, vector<1x128x128xf32>
    %7 = vector.shape_cast %6 : vector<1x128x128xf32> to vector<128x128xf32>
    %cst = arith.constant dense<0.000000e+00> : vector<128x128xf32>
    %8 = tpu.matmul %5, %5, %cst {dimension_numbers = #tpu.dot_dimension_numbers<[0], [0], [1], [1], [0, 1, 1, 1], [], []>} : vector<512x128xf32>, vector<512x128xf32>, vector<128x128xf32> -> vector<128x128xf32>
    %9 = arith.addf %7, %8 : vector<128x128xf32>
    %c0_7 = arith.constant 0 : index
    %c0_8 = arith.constant 0 : index
    %c0_9 = arith.constant 0 : index
    %10 = vector.load %arg3[%c0_7, %c0_8, %c0_9] : memref<1x128x128xf32, #tpu.memory_space<vmem>>, vector<1x128x128xf32>
    %11 = vector.shape_cast %10 : vector<1x128x128xf32> to vector<128x128xf32>
    %12 = vector.shape_cast %9 : vector<128x128xf32> to vector<1x128x128xf32>
    tpu.vector_store %arg3[%c0_7, %c0_8, %c0_9], %12 {strides = array<i32>} : memref<1x128x128xf32, #tpu.memory_space<vmem>>, vector<1x128x128xf32>,
    %cst_10 = arith.constant 1.000000e+00 : f32
    %13 = vector.broadcast %cst_10 : f32 to vector<1x512xf32>
    %c0_11 = arith.constant 0 : index
    %c0_12 = arith.constant 0 : index
    %c0_13 = arith.constant 0 : index
    %14 = vector.load %arg4[%c0_11, %c0_12, %c0_13] : memref<1x1x128xf32, #tpu.memory_space<vmem>>, vector<1x1x128xf32>
    %15 = vector.shape_cast %14 : vector<1x1x128xf32> to vector<1x128xf32>
    %cst_14 = arith.constant dense<0.000000e+00> : vector<1x128xf32>
    %16 = tpu.matmul %13, %5, %cst_14 {dimension_numbers = #tpu.dot_dimension_numbers<[1], [0], [0], [1], [0, 0, 1, 1], [], []>} : vector<1x512xf32>, vector<512x128xf32>, vector<1x128xf32> -> vector<1x128xf32>
    %17 = arith.addf %15, %16 : vector<1x128xf32>
    %c0_15 = arith.constant 0 : index
    %c0_16 = arith.constant 0 : index
    %c0_17 = arith.constant 0 : index
    %18 = vector.load %arg4[%c0_15, %c0_16, %c0_17] : memref<1x1x128xf32, #tpu.memory_space<vmem>>, vector<1x1x128xf32>
    %19 = vector.shape_cast %18 : vector<1x1x128xf32> to vector<1x128xf32>
    %20 = vector.shape_cast %17 : vector<1x128xf32> to vector<1x1x128xf32>
    tpu.vector_store %arg4[%c0_15, %c0_16, %c0_17], %20 {strides = array<i32>} : memref<1x1x128xf32, #tpu.memory_space<vmem>>, vector<1x1x128xf32>,
    return
  }
  func.func @transform_0(%arg0: i32, %arg1: i32) -> (i32, i32, i32, i32) {
    %c1_i32 = arith.constant 1 : i32
    %0 = arith.muli %arg0, %c1_i32 : i32
    %1 = arith.addi %0, %arg1 : i32
    %c0_i32 = arith.constant 0 : i32
    %c0_i32_0 = arith.constant 0 : i32
    %c0_i32_1 = arith.constant 0 : i32
    %c0_i32_2 = arith.constant 0 : i32
    return %1, %c0_i32, %c0_i32_0, %c0_i32_1 : i32, i32, i32, i32
  }
  func.func @transform_1(%arg0: i32, %arg1: i32) -> (i32, i32, i32) {
    %c0_i32 = arith.constant 0 : i32
    %c0_i32_0 = arith.constant 0 : i32
    %c0_i32_1 = arith.constant 0 : i32
    return %arg0, %c0_i32, %c0_i32_0 : i32, i32, i32
  }
  func.func @transform_2(%arg0: i32, %arg1: i32) -> (i32, i32, i32) {
    %c0_i32 = arith.constant 0 : i32
    %c0_i32_0 = arith.constant 0 : i32
    %c0_i32_1 = arith.constant 0 : i32
    return %arg0, %c0_i32, %c0_i32_0 : i32, i32, i32
  }
}

module attributes {stable_mosaic.version = 11 : i64} {
  func.func @cls_head_main_kernel(%arg0: i32, %arg1: memref<1x16x32x128xf32, #tpu.memory_space<vmem>>, %arg2: memref<128x128xf32, #tpu.memory_space<vmem>>, %arg3: memref<1x128xf32, #tpu.memory_space<vmem>>, %arg4: memref<16x128xf32, #tpu.memory_space<vmem>>, %arg5: memref<32x128xf32, #tpu.memory_space<vmem>>, %arg6: memref<1x16x128xf32, #tpu.memory_space<vmem>>) attributes {dimension_semantics = [#tpu.dimension_semantics<parallel>], iteration_bounds = array<i64: 2>, scalar_prefetch = 0 : i64, scratch_operands = 0 : i64, tpu.core_type = #tpu.core_type<tc>, window_params = [{transform_indices = @transform_0, window_bounds = array<i64: 1, 16, 32, 128>}, {pipeline_mode = #tpu.pipeline_mode<synchronous>, transform_indices = @transform_1, window_bounds = array<i64: 128, 128>}, {pipeline_mode = #tpu.pipeline_mode<synchronous>, transform_indices = @transform_2, window_bounds = array<i64: 1, 128>}, {pipeline_mode = #tpu.pipeline_mode<synchronous>, transform_indices = @transform_3, window_bounds = array<i64: 16, 128>}, {pipeline_mode = #tpu.pipeline_mode<synchronous>, transform_indices = @transform_4, window_bounds = array<i64: 32, 128>}, {transform_indices = @transform_5, window_bounds = array<i64: 1, 16, 128>}]} {
    %c0 = arith.constant 0 : index
    %c0_0 = arith.constant 0 : index
    %c0_1 = arith.constant 0 : index
    %c0_2 = arith.constant 0 : index
    %0 = vector.load %arg1[%c0, %c0_0, %c0_1, %c0_2] : memref<1x16x32x128xf32, #tpu.memory_space<vmem>>, vector<1x16x32x128xf32>
    %1 = vector.shape_cast %0 : vector<1x16x32x128xf32> to vector<16x32x128xf32>
    %2 = vector.shape_cast %1 : vector<16x32x128xf32> to vector<512x128xf32>
    %c0_3 = arith.constant 0 : index
    %c0_4 = arith.constant 0 : index
    %3 = vector.load %arg2[%c0_3, %c0_4] : memref<128x128xf32, #tpu.memory_space<vmem>>, vector<128x128xf32>
    %cst = arith.constant dense<0.000000e+00> : vector<512x128xf32>
    %4 = tpu.matmul %2, %3, %cst {dimension_numbers = #tpu.dot_dimension_numbers<[1], [0], [0], [1], [0, 0, 1, 1], [], []>} : vector<512x128xf32>, vector<128x128xf32>, vector<512x128xf32> -> vector<512x128xf32>
    %c0_5 = arith.constant 0 : index
    %c0_6 = arith.constant 0 : index
    %5 = vector.load %arg3[%c0_5, %c0_6] : memref<1x128xf32, #tpu.memory_space<vmem>>, vector<1x128xf32>
    %6 = vector.broadcast %5 : vector<1x128xf32> to vector<512x128xf32>
    %7 = arith.addf %4, %6 : vector<512x128xf32>
    %cst_7 = arith.constant 0.000000e+00 : f32
    %8 = vector.broadcast %cst_7 : f32 to vector<512x128xf32>
    %9 = arith.maximumf %7, %8 : vector<512x128xf32>
    %10 = vector.shape_cast %9 : vector<512x128xf32> to vector<16x32x128xf32>
    %c0_8 = arith.constant 0 : index
    %c0_9 = arith.constant 0 : index
    %11 = vector.load %arg4[%c0_8, %c0_9] : memref<16x128xf32, #tpu.memory_space<vmem>>, vector<16x128xf32>
    %12 = vector.shape_cast %11 : vector<16x128xf32> to vector<16x1x128xf32>
    %13 = vector.broadcast %12 : vector<16x1x128xf32> to vector<16x32x128xf32>
    %14 = arith.mulf %10, %13 : vector<16x32x128xf32>
    %cst_10 = arith.constant dense<0.000000e+00> : vector<32x128xf32>
    %15 = vector.multi_reduction <add>, %14, %cst_10 [0] : vector<16x32x128xf32> to vector<32x128xf32>
    %cst_11 = arith.constant dense<0.000000e+00> : vector<128xf32>
    %16 = vector.multi_reduction <add>, %15, %cst_11 [0] : vector<32x128xf32> to vector<128xf32>
    %17 = vector.shape_cast %16 : vector<128xf32> to vector<1x128xf32>
    %cst_12 = arith.constant 3.200000e+01 : f32
    %18 = vector.broadcast %cst_12 : f32 to vector<1x128xf32>
    %19 = arith.divf %17, %18 : vector<1x128xf32>
    %20 = arith.mulf %15, %15 : vector<32x128xf32>
    %cst_13 = arith.constant dense<0.000000e+00> : vector<128xf32>
    %21 = vector.multi_reduction <add>, %20, %cst_13 [0] : vector<32x128xf32> to vector<128xf32>
    %22 = vector.shape_cast %21 : vector<128xf32> to vector<1x128xf32>
    %cst_14 = arith.constant 3.200000e+01 : f32
    %23 = vector.broadcast %cst_14 : f32 to vector<1x128xf32>
    %24 = arith.divf %22, %23 : vector<1x128xf32>
    %25 = arith.mulf %19, %19 : vector<1x128xf32>
    %26 = arith.subf %24, %25 : vector<1x128xf32>
    %cst_15 = arith.constant 0.000000e+00 : f32
    %27 = vector.broadcast %cst_15 : f32 to vector<1x128xf32>
    %28 = arith.maximumf %26, %27 : vector<1x128xf32>
    %29 = vector.broadcast %19 : vector<1x128xf32> to vector<32x128xf32>
    %30 = arith.subf %15, %29 : vector<32x128xf32>
    %cst_16 = arith.constant 9.99999974E-6 : f32
    %31 = vector.broadcast %cst_16 : f32 to vector<1x128xf32>
    %32 = arith.addf %28, %31 : vector<1x128xf32>
    %33 = math.rsqrt %32 : vector<1x128xf32>
    %34 = vector.broadcast %33 : vector<1x128xf32> to vector<32x128xf32>
    %35 = arith.mulf %30, %34 : vector<32x128xf32>
    %36 = arith.negf %35 : vector<32x128xf32>
    %37 = math.exp %36 : vector<32x128xf32>
    %cst_17 = arith.constant 1.000000e+00 : f32
    %38 = vector.broadcast %cst_17 : f32 to vector<32x128xf32>
    %39 = arith.addf %38, %37 : vector<32x128xf32>
    %40 = arith.divf %38, %39 : vector<32x128xf32>
    %c0_18 = arith.constant 0 : index
    %c0_19 = arith.constant 0 : index
    %41 = vector.load %arg5[%c0_18, %c0_19] : memref<32x128xf32, #tpu.memory_space<vmem>>, vector<32x128xf32>
    %42 = arith.mulf %40, %41 : vector<32x128xf32>
    %43 = vector.shape_cast %42 : vector<32x128xf32> to vector<1x32x128xf32>
    %44 = vector.broadcast %43 : vector<1x32x128xf32> to vector<16x32x128xf32>
    %45 = arith.mulf %10, %44 : vector<16x32x128xf32>
    %cst_20 = arith.constant dense<0.000000e+00> : vector<16x128xf32>
    %46 = vector.multi_reduction <add>, %45, %cst_20 [1] : vector<16x32x128xf32> to vector<16x128xf32>
    %c0_21 = arith.constant 0 : index
    %c0_22 = arith.constant 0 : index
    %c0_23 = arith.constant 0 : index
    %47 = vector.load %arg6[%c0_21, %c0_22, %c0_23] : memref<1x16x128xf32, #tpu.memory_space<vmem>>, vector<1x16x128xf32>
    %48 = vector.shape_cast %47 : vector<1x16x128xf32> to vector<16x128xf32>
    %49 = vector.shape_cast %46 : vector<16x128xf32> to vector<1x16x128xf32>
    tpu.vector_store %arg6[%c0_21, %c0_22, %c0_23], %49 {strides = array<i32>} : memref<1x16x128xf32, #tpu.memory_space<vmem>>, vector<1x16x128xf32>,
    return
  }
  func.func @transform_0(%arg0: i32) -> (i32, i32, i32, i32) {
    %c0_i32 = arith.constant 0 : i32
    %c0_i32_0 = arith.constant 0 : i32
    %c0_i32_1 = arith.constant 0 : i32
    %c0_i32_2 = arith.constant 0 : i32
    return %arg0, %c0_i32, %c0_i32_0, %c0_i32_1 : i32, i32, i32, i32
  }
  func.func @transform_1(%arg0: i32) -> (i32, i32) {
    %c0_i32 = arith.constant 0 : i32
    %c0_i32_0 = arith.constant 0 : i32
    %c0_i32_1 = arith.constant 0 : i32
    return %c0_i32, %c0_i32_0 : i32, i32
  }
  func.func @transform_2(%arg0: i32) -> (i32, i32) {
    %c0_i32 = arith.constant 0 : i32
    %c0_i32_0 = arith.constant 0 : i32
    %c0_i32_1 = arith.constant 0 : i32
    return %c0_i32, %c0_i32_0 : i32, i32
  }
  func.func @transform_3(%arg0: i32) -> (i32, i32) {
    %c0_i32 = arith.constant 0 : i32
    %c0_i32_0 = arith.constant 0 : i32
    %c0_i32_1 = arith.constant 0 : i32
    return %c0_i32, %c0_i32_0 : i32, i32
  }
  func.func @transform_4(%arg0: i32) -> (i32, i32) {
    %c0_i32 = arith.constant 0 : i32
    %c0_i32_0 = arith.constant 0 : i32
    %c0_i32_1 = arith.constant 0 : i32
    return %c0_i32, %c0_i32_0 : i32, i32
  }
  func.func @transform_5(%arg0: i32) -> (i32, i32, i32) {
    %c0_i32 = arith.constant 0 : i32
    %c0_i32_0 = arith.constant 0 : i32
    %c0_i32_1 = arith.constant 0 : i32
    return %arg0, %c0_i32, %c0_i32_0 : i32, i32, i32
  }
}

</mosaic_0001>

<bundles_post_ra>
// kernel: cls_head_forward.2
= control target key start
LH: loop header
LB: loop body
LE: loop exit
PB: predicated region body
PF: predicated region fallthrough
CT: control target
= control target key end

     0   :  { %s1180_s9 = smov 0   ;;  %s1182_s10 = smov 0   ;;  %s1630_s0 = inlined_call_operand.vmem [shape: f32[2,16,32,128], index: 0, kind: input, shape index: {}]   ;;  %s1631_s1 = inlined_call_operand.vmem [shape: f32[2,128,128], index: 1, kind: output, shape index: {0}]   ;;  %s1632_s2 = inlined_call_operand.vmem [shape: f32[2,1,128], index: 2, kind: output, shape index: {1}]  }
   0x1   :  { %s1184_s11 = smov 0  }
   0x2 LB: > { %s25_s12 = sadd.s32 1, %s1157_s10  ;;  %p868_p0 = scmp.ge.s32.totalorder %s1161_s11, 1  ;;  %s1161_s11 = sphi %s1184_s11, %s13_s11   ;;  %s1157_s10 = sphi %s1182_s10, %s1648_s10   ;;  %s1153_s9 = sphi %s1180_s9, %s1647_s9  }
   0x3   : > { %p27_p1 = scmp.ge.s32.totalorder %s25_s12, 2  ;;  %p131_p2 = scmp.lt.s32.totalorder %s1161_s11, 3 }
   0x5   : > { %s1650_s12 = smov (%p27_p1, %s25_s12), 0  ;;  %p132_p3 = pnand %p868_p0, %p131_p2 }
   0x7   : > { %135 = sbr.rel (%p132_p3) target bundleno = 455 (0x1c7), region = 24 }
   0xc   : > { %p158_p4 = scmp.lt.s32.totalorder %s1153_s9, 1 }
   0xe   : > { %s1652_s9 = smov (!%p158_p4, %s1153_s9), 1 }
   0xf   : > { %s875_s13 = sshll.u32 %s1652_s9, 9  ;;  %s1594_s19 = scalar_lea.vmem %s1632_s2, %s1652_s9 }
  0x10   : > { %s1204_s16 = scalar_lea.vmem %s1630_s0, %s875_s13  ;;  %s876_s20 = sshll.u32 %s1652_s9, 7 }
  0x11   : > { %v1207_v0 = vld [vmem:[%s1204_s16 + $0x100] sm:$0xff]  ;;  %v1223_v6 = vld [vmem:[%s1204_s16 + $0x108] sm:$0xff]  ;;  %v1239_v12 = vld [vmem:[%s1204_s16 + $0x110] sm:$0xff]  ;;  %s1601_s23 = scalar_lea.vmem %s1631_s1, %s876_s20 }
  0x12   : > { %v1210_v1 = vld [vmem:[%s1204_s16 + $0x180] sm:$0xff]  ;;  %v1226_v7 = vld [vmem:[%s1204_s16 + $0x188] sm:$0xff]  ;;  %v1242_v13 = vld [vmem:[%s1204_s16 + $0x190] sm:$0xff] }
  0x13   : > { %v1213_v2 = vld [vmem:[%s1204_s16] sm:$0xff]  ;;  %v915_v3 = vpack.i.bf16 %v1210_v1, %v1207_v0  ;;  %1641 = vst [vmem:[#allocation4_spill] sm:$0xff] %v1226_v7  ;;  %v1229_v8 = vld [vmem:[%s1204_s16 + $0x8] sm:$0xff]  ;;  %v917_v10 = vpack.i.bf16 %v1226_v7, %v1223_v6  ;;  %v1245_v14 = vld [vmem:[%s1204_s16 + $0x10] sm:$0xff]  ;;  %v919_v16 = vpack.i.bf16 %v1242_v13, %v1239_v12 }
  0x14   : > { %1639 = vst [vmem:[#allocation2_spill] sm:$0xff] %v1213_v2  ;;  %v1218_v4 = vld [vmem:[%s1204_s16 + $0x80] sm:$0xff]  ;;  %v1232_v9 = vld [vmem:[%s1204_s16 + $0x88] sm:$0xff]  ;;  %v1248_v15 = vld [vmem:[%s1204_s16 + $0x90] sm:$0xff] }
  0x15   : > { %1640 = vst [vmem:[#allocation3_spill] sm:$0xff] %v1218_v4  ;;  %v1027_v5 = vpack.i.bf16 %v1218_v4, %v1213_v2  ;;  %916 = vxpose.xlu0.b32.start [1/16] %v915_v3, 128  ;;  %v1029_v11 = vpack.i.bf16 %v1232_v9, %v1229_v8  ;;  %v1031_v17 = vpack.i.bf16 %v1248_v15, %v1245_v14  ;;  %v1255_v18 = vld [vmem:[%s1204_s16 + $0x118] sm:$0xff]  ;;  %v1271_v24 = vld [vmem:[%s1204_s16 + $0x120] sm:$0xff]  ;;  %v1287_v30 = vld [vmem:[%s1204_s16 + $0x128] sm:$0xff] }
  0x16   : > { %v1258_v19 = vld [vmem:[%s1204_s16 + $0x198] sm:$0xff]  ;;  %v1274_v25 = vld [vmem:[%s1204_s16 + $0x1a0] sm:$0xff]  ;;  %v1290_v31 = vld [vmem:[%s1204_s16 + $0x1a8] sm:$0xff] }
  0x17   : > { %1028 = vxpose.xlu1.b32.start [1/16] %v1027_v5, 128  ;;  %v1261_v20 = vld [vmem:[%s1204_s16 + $0x18] sm:$0xff]  ;;  %v921_v22 = vpack.i.bf16 %v1258_v19, %v1255_v18  ;;  %v1277_v26 = vld [vmem:[%s1204_s16 + $0x20] sm:$0xff]  ;;  %v923_v28 = vpack.i.bf16 %v1274_v25, %v1271_v24  ;;  %v1293_v32 = vld [vmem:[%s1204_s16 + $0x28] sm:$0xff]  ;;  %v925_v34 = vpack.i.bf16 %v1290_v31, %v1287_v30 }
  0x18   : > { %v1264_v21 = vld [vmem:[%s1204_s16 + $0x98] sm:$0xff]  ;;  %v1280_v27 = vld [vmem:[%s1204_s16 + $0xa0] sm:$0xff]  ;;  %v1296_v33 = vld [vmem:[%s1204_s16 + $0xa8] sm:$0xff] }
  0x19   : > { %v1033_v23 = vpack.i.bf16 %v1264_v21, %v1261_v20  ;;  %v1035_v29 = vpack.i.bf16 %v1280_v27, %v1277_v26  ;;  %v1037_v35 = vpack.i.bf16 %v1296_v33, %v1293_v32  ;;  %v1303_v36 = vld [vmem:[%s1204_s16 + $0x130] sm:$0xff]  ;;  %v1319_v42 = vld [vmem:[%s1204_s16 + $0x138] sm:$0xff]  ;;  %v1335_v48 = vld [vmem:[%s1204_s16 + $0x140] sm:$0xff] }
  0x1a   : > { %v1306_v37 = vld [vmem:[%s1204_s16 + $0x1b0] sm:$0xff]  ;;  %v1322_v43 = vld [vmem:[%s1204_s16 + $0x1b8] sm:$0xff]  ;;  %v1338_v49 = vld [vmem:[%s1204_s16 + $0x1c0] sm:$0xff] }
  0x1b   : > { %v1309_v38 = vld [vmem:[%s1204_s16 + $0x30] sm:$0xff]  ;;  %v927_v40 = vpack.i.bf16 %v1306_v37, %v1303_v36  ;;  %v1325_v44 = vld [vmem:[%s1204_s16 + $0x38] sm:$0xff]  ;;  %v929_v46 = vpack.i.bf16 %v1322_v43, %v1319_v42  ;;  %v1341_v50 = vld [vmem:[%s1204_s16 + $0x40] sm:$0xff]  ;;  %v931_v52 = vpack.i.bf16 %v1338_v49, %v1335_v48 }
  0x1c   : > { %v1312_v39 = vld [vmem:[%s1204_s16 + $0xb0] sm:$0xff]  ;;  %v1328_v45 = vld [vmem:[%s1204_s16 + $0xb8] sm:$0xff]  ;;  %v1344_v51 = vld [vmem:[%s1204_s16 + $0xc0] sm:$0xff] }
  0x1d   : > { %918 = vxpose.xlu0.b32.cont [2/16] %v917_v10, 128  ;;  %v1039_v41 = vpack.i.bf16 %v1312_v39, %v1309_v38  ;;  %v1041_v47 = vpack.i.bf16 %v1328_v45, %v1325_v44  ;;  %v1043_v53 = vpack.i.bf16 %v1344_v51, %v1341_v50  ;;  %v1351_v54 = vld [vmem:[%s1204_s16 + $0x148] sm:$0xff]  ;;  %v1367_v60 = vld [vmem:[%s1204_s16 + $0x150] sm:$0xff]  ;;  %v1383_v10 = vld [vmem:[%s1204_s16 + $0x158] sm:$0xff] }
  0x1e   : > { %v1354_v55 = vld [vmem:[%s1204_s16 + $0x1c8] sm:$0xff]  ;;  %v1370_v61 = vld [vmem:[%s1204_s16 + $0x1d0] sm:$0xff] }
  0x1f   : > { %1030 = vxpose.xlu1.b32.cont [2/16] %v1029_v11, 128  ;;  %v1357_v56 = vld [vmem:[%s1204_s16 + $0x48] sm:$0xff]  ;;  %v933_v58 = vpack.i.bf16 %v1354_v55, %v1351_v54  ;;  %1642 = vst [vmem:[#allocation5_spill] sm:$0xff] %v1370_v61  ;;  %v1373_v62 = vld [vmem:[%s1204_s16 + $0x50] sm:$0xff]  ;;  %v935_v3 = vpack.i.bf16 %v1370_v61, %v1367_v60  ;;  %v1386_v11 = vld [vmem:[%s1204_s16 + $0x1d8] sm:$0xff] }
  0x20   : > { %v1360_v57 = vld [vmem:[%s1204_s16 + $0xc8] sm:$0xff]  ;;  %v1376_v63 = vld [vmem:[%s1204_s16 + $0xd0] sm:$0xff] }
  0x21   : > { %v1045_v59 = vpack.i.bf16 %v1360_v57, %v1357_v56  ;;  %v1047_v5 = vpack.i.bf16 %v1376_v63, %v1373_v62  ;;  %v1462_v2 = vld [vmem:[%s1204_s16 + $0xe8] sm:$0xff] }
  0x25   : > { %920 = vxpose.xlu0.b32.cont [3/16] %v919_v16, 128  ;;  %v1389_v16 = vld [vmem:[%s1204_s16 + $0x178] sm:$0xff] }
  0x26   : > { %531 = vmatpush.msra.mxu2 %v1389_v16 }
  0x27   : > { %1032 = vxpose.xlu1.b32.cont [3/16] %v1031_v17, 128  ;;  %v1392_v17 = vld [vmem:[%s1204_s16 + $0x1f8] sm:$0xff] }
  0x28   : > { %596 = vmatpush.msra.mxu3 %v1392_v17 }
  0x2d   : > { %922 = vxpose.xlu0.b32.cont [4/16] %v921_v22, 128  ;;  %v1395_v22 = vld [vmem:[%s1204_s16 + $0x58] sm:$0xff] }
  0x2f   : > { %1034 = vxpose.xlu1.b32.cont [4/16] %v1033_v23, 128  ;;  %v1398_v23 = vld [vmem:[%s1204_s16 + $0xd8] sm:$0xff] }
  0x35   : > { %924 = vxpose.xlu0.b32.cont [5/16] %v923_v28, 128  ;;  %v1403_v28 = vld [vmem:[%s1204_s16 + $0x170] sm:$0xff] }
  0x36   : > { %532 = vmatpush.msra.mxu2 %v1403_v28 }
  0x37   : > { %1036 = vxpose.xlu1.b32.cont [5/16] %v1035_v29, 128  ;;  %v1406_v29 = vld [vmem:[%s1204_s16 + $0x1f0] sm:$0xff] }
  0x38   : > { %597 = vmatpush.msra.mxu3 %v1406_v29 }
  0x3d   : > { %926 = vxpose.xlu0.b32.cont [6/16] %v925_v34, 128  ;;  %v937_v34 = vpack.i.bf16 %v1386_v11, %v1383_v10 }
  0x3f   : > { %1038 = vxpose.xlu1.b32.cont [6/16] %v1037_v35, 128  ;;  %v1049_v35 = vpack.i.bf16 %v1398_v23, %v1395_v22 }
  0x45   : > { %928 = vxpose.xlu0.b32.cont [7/16] %v927_v40, 128  ;;  %v1415_v40 = vld [vmem:[%s1204_s16 + $0x168] sm:$0xff] }
  0x46   : > { %533 = vmatpush.msra.mxu2 %v1415_v40 }
  0x47   : > { %1040 = vxpose.xlu1.b32.cont [7/16] %v1039_v41, 128  ;;  %v1418_v41 = vld [vmem:[%s1204_s16 + $0x1e8] sm:$0xff] }
  0x48   : > { %598 = vmatpush.msra.mxu3 %v1418_v41 }
  0x4d   : > { %930 = vxpose.xlu0.b32.cont [8/16] %v929_v46, 128  ;;  %v1423_v46 = vld [vmem:[%s1204_s16 + $0x160] sm:$0xff] }
  0x4e   : > { %534 = vmatpush.msra.mxu2 %v1423_v46 }
  0x4f   : > { %1042 = vxpose.xlu1.b32.cont [8/16] %v1041_v47, 128  ;;  %v1426_v47 = vld [vmem:[%s1204_s16 + $0x78] sm:$0xff] }
  0x50   : > { %401 = vmatpush.msra.mxu0 %v1426_v47  ;;  %535 = vmatpush.msra.mxu2 %v1383_v10 }
  0x52   : > { %536 = vmatpush.msra.mxu2 %v1367_v60 }
  0x54   : > { %537 = vmatpush.msra.mxu2 %v1351_v54 }
  0x55   : > { %932 = vxpose.xlu0.b32.cont [9/16] %v931_v52, 128  ;;  %v1430_v52 = vld [vmem:[%s1204_s16 + $0x1e0] sm:$0xff] }
  0x56   : > { %599 = vmatpush.msra.mxu3 %v1430_v52  ;;  %538 = vmatpush.msra.mxu2 %v1335_v48 }
  0x57   : > { %1044 = vxpose.xlu1.b32.cont [9/16] %v1043_v53, 128  ;;  %v1433_v53 = vld [vmem:[%s1204_s16 + $0xf8] sm:$0xff] }
  0x58   : > { %466 = vmatpush.msra.mxu1 %v1433_v53  ;;  %600 = vmatpush.msra.mxu3 %v1386_v11 }
  0x59   : > { %539 = vmatpush.msra.mxu2 %v1319_v42 }
  0x5a   : > { %601 = vmatpush.msra.mxu3 %v1370_v61  ;;  %v941_v61 = vpack.i.bf16 %v1418_v41, %v1415_v40 }
  0x5b   : > { %540 = vmatpush.msra.mxu2 %v1303_v36 }
  0x5c   : > { %602 = vmatpush.msra.mxu3 %v1354_v55 }
  0x5d   : > { %934 = vxpose.xlu0.b32.cont [10/16] %v933_v58, 128  ;;  %v1437_v58 = vld [vmem:[%s1204_s16 + $0x60] sm:$0xff]  ;;  %541 = vmatpush.msra.mxu2 %v1287_v30 }
  0x5e   : > { %603 = vmatpush.msra.mxu3 %v1338_v49 }
  0x5f   : > { %1046 = vxpose.xlu1.b32.cont [10/16] %v1045_v59, 128  ;;  %v1440_v59 = vld [vmem:[%s1204_s16 + $0xe0] sm:$0xff]  ;;  %542 = vmatpush.msra.mxu2 %v1271_v24 }
  0x60   : > { %v1051_v4 = vpack.i.bf16 %v1440_v59, %v1437_v58  ;;  %604 = vmatpush.msra.mxu3 %v1322_v43 }
  0x61   : > { %543 = vmatpush.msra.mxu2 %v1255_v18 }
  0x62   : > { %605 = vmatpush.msra.mxu3 %v1306_v37 }
  0x63   : > { %544 = vmatpush.msra.mxu2 %v1239_v12 }
  0x64   : > { %606 = vmatpush.msra.mxu3 %v1290_v31 }
  0x65   : > { %936 = vxpose.xlu0.b32.cont [11/16] %v935_v3, 128  ;;  %v1443_v3 = vld [vmem:[%s1204_s16 + $0x70] sm:$0xff]  ;;  %545 = vmatpush.msra.mxu2 %v1223_v6 }
  0x66   : > { %402 = vmatpush.msra.mxu0 %v1443_v3  ;;  %607 = vmatpush.msra.mxu3 %v1274_v25 }
  0x67   : > { %1048 = vxpose.xlu1.b32.cont [11/16] %v1047_v5, 128  ;;  %v1448_v5 = vld [vmem:[%s1204_s16 + $0xf0] sm:$0xff]  ;;  %546 = vmatpush.msra.mxu2 %v1207_v0 }
  0x68   : > { %467 = vmatpush.msra.mxu1 %v1448_v5  ;;  %608 = vmatpush.msra.mxu3 %v1258_v19 }
  0x69   : > { %734 = vmatpush.msrb.mxu2 %v1389_v16 }
  0x6a   : > { %468 = vmatpush.msra.mxu1 %v1462_v2  ;;  %609 = vmatpush.msra.mxu3 %v1242_v13 }
  0x6b   : > { %735 = vmatpush.msrb.mxu2 %v1403_v28 }
  0x6c   : > { %469 = vmatpush.msra.mxu1 %v1440_v59  ;;  %610 = vmatpush.msra.mxu3 %v1226_v7  ;;  %v1644_v7 = vld [vmem:[#allocation3_spill] sm:$0xff] }
  0x6d   : > { %938 = vxpose.xlu0.b32.cont [12/16] %v937_v34, 128  ;;  %v939_v34 = vpack.i.bf16 %v1430_v52, %v1423_v46  ;;  %736 = vmatpush.msrb.mxu2 %v1415_v40 }
  0x6e   : > { %470 = vmatpush.msra.mxu1 %v1398_v23  ;;  %611 = vmatpush.msra.mxu3 %v1210_v1 }
  0x6f   : > { %1050 = vxpose.xlu1.b32.cont [12/16] %v1049_v35, 128  ;;  %v1455_v35 = vld [vmem:[%s1204_s16 + $0x68] sm:$0xff]  ;;  %737 = vmatpush.msrb.mxu2 %v1423_v46 }
  0x70   : > { %403 = vmatpush.msra.mxu0 %v1455_v35  ;;  %471 = vmatpush.msra.mxu1 %v1376_v63 }
  0x71   : > { %754 = vmatpush.msrb.mxu3 %v1392_v17  ;;  %738 = vmatpush.msrb.mxu2 %v1383_v10 }
  0x72   : > { %404 = vmatpush.msra.mxu0 %v1437_v58  ;;  %472 = vmatpush.msra.mxu1 %v1360_v57 }
  0x73   : > { %755 = vmatpush.msrb.mxu3 %v1406_v29  ;;  %739 = vmatpush.msrb.mxu2 %v1367_v60 }
  0x74   : > { %405 = vmatpush.msra.mxu0 %v1395_v22  ;;  %473 = vmatpush.msra.mxu1 %v1344_v51 }
  0x75   : > { %940 = vxpose.xlu0.b32.cont [13/16] %v939_v34, 128  ;;  %v943_v34 = vpack.i.bf16 %v1406_v29, %v1403_v28  ;;  %756 = vmatpush.msrb.mxu3 %v1418_v41 }
  0x76   : > { %406 = vmatpush.msra.mxu0 %v1373_v62  ;;  %474 = vmatpush.msra.mxu1 %v1328_v45 }
  0x77   : > { %1052 = vxpose.xlu1.b32.cont [13/16] %v1051_v4, 128  ;;  %v1053_v4 = vpack.i.bf16 %v1462_v2, %v1455_v35  ;;  %757 = vmatpush.msrb.mxu3 %v1430_v52 }
  0x78   : > { %407 = vmatpush.msra.mxu0 %v1357_v56  ;;  %475 = vmatpush.msra.mxu1 %v1312_v39 }
  0x79   : > { %758 = vmatpush.msrb.mxu3 %v1386_v11  ;;  %740 = vmatpush.msrb.mxu2 %v1351_v54 }
  0x7a   : > { %408 = vmatpush.msra.mxu0 %v1341_v50  ;;  %476 = vmatpush.msra.mxu1 %v1296_v33 }
  0x7b   : > { %741 = vmatpush.msrb.mxu2 %v1335_v48 }
  0x7c   : > { %409 = vmatpush.msra.mxu0 %v1325_v44  ;;  %477 = vmatpush.msra.mxu1 %v1280_v27 }
  0x7d   : > { %942 = vxpose.xlu0.b32.cont [14/16] %v941_v61, 128  ;;  %v1055_v61 = vpack.i.bf16 %v1448_v5, %v1443_v3  ;;  %742 = vmatpush.msrb.mxu2 %v1319_v42 }
  0x7e   : > { %410 = vmatpush.msra.mxu0 %v1309_v38  ;;  %478 = vmatpush.msra.mxu1 %v1264_v21 }
  0x7f   : > { %1054 = vxpose.xlu1.b32.cont [14/16] %v1053_v4, 128  ;;  %v945_v4 = vpack.i.bf16 %v1392_v17, %v1389_v16  ;;  %v1645_v16 = vld [vmem:[#allocation5_spill] sm:$0xff]  ;;  %743 = vmatpush.msrb.mxu2 %v1303_v36 }
  0x80   : > { %411 = vmatpush.msra.mxu0 %v1293_v32  ;;  %479 = vmatpush.msra.mxu1 %v1248_v15 }
  0x81   : > { %759 = vmatpush.msrb.mxu3 %v1645_v16  ;;  %744 = vmatpush.msrb.mxu2 %v1287_v30 }
  0x82   : > { %412 = vmatpush.msra.mxu0 %v1277_v26  ;;  %480 = vmatpush.msra.mxu1 %v1232_v9 }
  0x83   : > { %760 = vmatpush.msrb.mxu3 %v1354_v55  ;;  %745 = vmatpush.msrb.mxu2 %v1271_v24 }
  0x84   : > { %413 = vmatpush.msra.mxu0 %v1261_v20  ;;  %481 = vmatpush.msra.mxu1 %v1644_v7 }
  0x85   : > { %944 = vxpose.xlu0.b32.cont [15/16] %v943_v34, 128  ;;  %v1057_v34 = vpack.i.bf16 %v1433_v53, %v1426_v47  ;;  %761 = vmatpush.msrb.mxu3 %v1338_v49 }
  0x86   : > { %414 = vmatpush.msra.mxu0 %v1245_v14  ;;  %714 = vmatpush.msrb.mxu1 %v1433_v53 }
  0x87   : > { %1056 = vxpose.xlu1.b32.cont [15/16] %v1055_v61, 128  ;;  %v1643_v61 = vld [vmem:[#allocation2_spill] sm:$0xff]  ;;  %762 = vmatpush.msrb.mxu3 %v1322_v43 }
  0x88   : > { %415 = vmatpush.msra.mxu0 %v1229_v8  ;;  %715 = vmatpush.msrb.mxu1 %v1448_v5 }
  0x89   : > { %763 = vmatpush.msrb.mxu3 %v1306_v37  ;;  %746 = vmatpush.msrb.mxu2 %v1255_v18 }
  0x8a   : > { %416 = vmatpush.msra.mxu0 %v1643_v61  ;;  %716 = vmatpush.msrb.mxu1 %v1462_v2  ;;  %v1646_v2 = vld [vmem:[#allocation4_spill] sm:$0xff] }
  0x8b   : > { %764 = vmatpush.msrb.mxu3 %v1290_v31  ;;  %747 = vmatpush.msrb.mxu2 %v1239_v12 }
  0x8c   : > { %694 = vmatpush.msrb.mxu0 %v1426_v47  ;;  %717 = vmatpush.msrb.mxu1 %v1440_v59 }
  0x8d   : > { %946 = vxpose.xlu0.b32.end [16/16] %v945_v4, 128  ;;  %765 = vmatpush.msrb.mxu3 %v1274_v25 }
  0x8e   : > { %695 = vmatpush.msrb.mxu0 %v1443_v3  ;;  %718 = vmatpush.msrb.mxu1 %v1398_v23 }
  0x8f   : > { %1058 = vxpose.xlu1.b32.end [16/16] %v1057_v34, 128  ;;  %766 = vmatpush.msrb.mxu3 %v1258_v19 }
  0x90   : > { %696 = vmatpush.msrb.mxu0 %v1455_v35  ;;  %719 = vmatpush.msrb.mxu1 %v1376_v63 }
  0x91   : > { %767 = vmatpush.msrb.mxu3 %v1242_v13  ;;  %748 = vmatpush.msrb.mxu2 %v1223_v6 }
  0x92   : > { %697 = vmatpush.msrb.mxu0 %v1437_v58  ;;  %720 = vmatpush.msrb.mxu1 %v1360_v57 }
  0x93   : > { %768 = vmatpush.msrb.mxu3 %v1646_v2  ;;  %749 = vmatpush.msrb.mxu2 %v1207_v0 }
  0x94   : > { %698 = vmatpush.msrb.mxu0 %v1395_v22  ;;  %721 = vmatpush.msrb.mxu1 %v1344_v51 }
  0x95   : > { %769 = vmatpush.msrb.mxu3 %v1210_v1 }
  0x96   : > { %699 = vmatpush.msrb.mxu0 %v1373_v62  ;;  %722 = vmatpush.msrb.mxu1 %v1328_v45 }
  0x98   : > { %700 = vmatpush.msrb.mxu0 %v1357_v56  ;;  %723 = vmatpush.msrb.mxu1 %v1312_v39 }
  0x9a   : > { %701 = vmatpush.msrb.mxu0 %v1341_v50  ;;  %724 = vmatpush.msrb.mxu1 %v1296_v33 }
  0x9c   : > { %702 = vmatpush.msrb.mxu0 %v1325_v44  ;;  %725 = vmatpush.msrb.mxu1 %v1280_v27 }
  0x9e   : > { %703 = vmatpush.msrb.mxu0 %v1309_v38  ;;  %726 = vmatpush.msrb.mxu1 %v1264_v21 }
  0xa0   : > { %704 = vmatpush.msrb.mxu0 %v1293_v32  ;;  %727 = vmatpush.msrb.mxu1 %v1248_v15 }
  0xa2   : > { %705 = vmatpush.msrb.mxu0 %v1277_v26  ;;  %728 = vmatpush.msrb.mxu1 %v1232_v9 }
  0xa4   : > { %706 = vmatpush.msrb.mxu0 %v1261_v20  ;;  %729 = vmatpush.msrb.mxu1 %v1644_v7 }
  0xa6   : > { %707 = vmatpush.msrb.mxu0 %v1245_v14 }
  0xa8   : > { %708 = vmatpush.msrb.mxu0 %v1229_v8 }
  0xaa   : > { %709 = vmatpush.msrb.mxu0 %v1643_v61 }
  0xb9   : > { %v947_v12 = vpop.trf.xlu0 }
  0xba   : > { %v948_v13 = vunpack.i.l.bf16 %v947_v12  ;;  %v951_v14 = vunpack.i.h.bf16 %v947_v12 }
  0xbb   : > { %v1059_v15 = vpop.trf.xlu1 }
  0xbc   : > { %v1060_v18 = vunpack.i.l.bf16 %v1059_v15  ;;  %v1063_v6 = vunpack.i.h.bf16 %v1059_v15  ;;  %547 = vmatmul.f32.vlgmr.msra.gmra.mxu2 %v948_v13  ;;  %612 = vmatmul.f32.vlgmr.msra.gmra.mxu3 %v951_v14 }
  0xbe   : > { %417 = vmatmul.f32.vlgmr.msra.gmra.mxu0 %v1060_v18  ;;  %482 = vmatmul.f32.vlgmr.msra.gmra.mxu1 %v1063_v6 }
  0xc1   : > { %v952_v8 = vpop.trf.xlu0 }
  0xc2   : > { %v953_v9 = vunpack.i.l.bf16 %v952_v8  ;;  %v956_v19 = vunpack.i.h.bf16 %v952_v8 }
  0xc3   : > { %v1064_v0 = vpop.trf.xlu1 }
  0xc4   : > { %v1065_v20 = vunpack.i.l.bf16 %v1064_v0  ;;  %v1068_v1 = vunpack.i.h.bf16 %v1064_v0  ;;  %550 = vmatmul.f32.gmra.mxu2 %v953_v9  ;;  %615 = vmatmul.f32.gmra.mxu3 %v956_v19 }
  0xc6   : > { %420 = vmatmul.f32.gmra.mxu0 %v1065_v20  ;;  %485 = vmatmul.f32.gmra.mxu1 %v1068_v1 }
  0xc9   : > { %v957_v7 = vpop.trf.xlu0 }
  0xca   : > { %v958_v21 = vunpack.i.l.bf16 %v957_v7  ;;  %v961_v24 = vunpack.i.h.bf16 %v957_v7 }
  0xcb   : > { %v1069_v25 = vpop.trf.xlu1 }
  0xcc   : > { %v1070_v26 = vunpack.i.l.bf16 %v1069_v25  ;;  %v1073_v27 = vunpack.i.h.bf16 %v1069_v25  ;;  %553 = vmatmul.f32.gmra.mxu2 %v958_v21  ;;  %618 = vmatmul.f32.gmra.mxu3 %v961_v24 }
  0xce   : > { %423 = vmatmul.f32.gmra.mxu0 %v1070_v26  ;;  %488 = vmatmul.f32.gmra.mxu1 %v1073_v27 }
  0xd1   : > { %v962_v30 = vpop.trf.xlu0 }
  0xd2   : > { %v963_v31 = vunpack.i.l.bf16 %v962_v30  ;;  %v966_v32 = vunpack.i.h.bf16 %v962_v30 }
  0xd3   : > { %v1074_v33 = vpop.trf.xlu1 }
  0xd4   : > { %v1075_v36 = vunpack.i.l.bf16 %v1074_v33  ;;  %v1078_v37 = vunpack.i.h.bf16 %v1074_v33  ;;  %556 = vmatmul.f32.gmra.mxu2 %v963_v31  ;;  %621 = vmatmul.f32.gmra.mxu3 %v966_v32 }
  0xd6   : > { %426 = vmatmul.f32.gmra.mxu0 %v1075_v36  ;;  %491 = vmatmul.f32.gmra.mxu1 %v1078_v37 }
  0xd9   : > { %v967_v38 = vpop.trf.xlu0 }
  0xda   : > { %v968_v39 = vunpack.i.l.bf16 %v967_v38  ;;  %v971_v42 = vunpack.i.h.bf16 %v967_v38 }
  0xdb   : > { %v1079_v43 = vpop.trf.xlu1 }
  0xdc   : > { %v1080_v44 = vunpack.i.l.bf16 %v1079_v43  ;;  %v1083_v45 = vunpack.i.h.bf16 %v1079_v43  ;;  %559 = vmatmul.f32.gmra.mxu2 %v968_v39  ;;  %624 = vmatmul.f32.gmra.mxu3 %v971_v42 }
  0xde   : > { %429 = vmatmul.f32.gmra.mxu0 %v1080_v44  ;;  %494 = vmatmul.f32.gmra.mxu1 %v1083_v45 }
  0xe1   : > { %v972_v48 = vpop.trf.xlu0 }
  0xe2   : > { %v973_v49 = vunpack.i.l.bf16 %v972_v48  ;;  %v976_v50 = vunpack.i.h.bf16 %v972_v48 }
  0xe3   : > { %v1084_v51 = vpop.trf.xlu1 }
  0xe4   : > { %v1085_v54 = vunpack.i.l.bf16 %v1084_v51  ;;  %v1088_v55 = vunpack.i.h.bf16 %v1084_v51  ;;  %562 = vmatmul.f32.gmra.mxu2 %v973_v49  ;;  %627 = vmatmul.f32.gmra.mxu3 %v976_v50 }
  0xe6   : > { %432 = vmatmul.f32.gmra.mxu0 %v1085_v54  ;;  %497 = vmatmul.f32.gmra.mxu1 %v1088_v55  ;;  %v1163_v54 = vmov 1.0  }
  0xe9   : > { %v977_v56 = vpop.trf.xlu0 }
  0xea   : > { %v978_v57 = vunpack.i.l.bf16 %v977_v56  ;;  %v981_v60 = vunpack.i.h.bf16 %v977_v56  ;;  %v1164_v56 = vmov 0.0  }
  0xeb   : > { %v1089_v62 = vpop.trf.xlu1  ;;  %192 = vst [vmem:[%s1594_s19] sm:$0x1] %v1164_v56 }
  0xec   : > { %v1090_v63 = vunpack.i.l.bf16 %v1089_v62  ;;  %v1093_v10 = vunpack.i.h.bf16 %v1089_v62  ;;  %565 = vmatmul.f32.gmra.mxu2 %v978_v57  ;;  %630 = vmatmul.f32.gmra.mxu3 %v981_v60 }
  0xee   : > { %435 = vmatmul.f32.gmra.mxu0 %v1090_v63  ;;  %500 = vmatmul.f32.gmra.mxu1 %v1093_v10 }
  0xf1   : > { %v982_v11 = vpop.trf.xlu0 }
  0xf2   : > { %v983_v17 = vunpack.i.l.bf16 %v982_v11  ;;  %v986_v22 = vunpack.i.h.bf16 %v982_v11 }
  0xf3   : > { %v1094_v23 = vpop.trf.xlu1 }
  0xf4   : > { %v1095_v28 = vunpack.i.l.bf16 %v1094_v23  ;;  %v1098_v29 = vunpack.i.h.bf16 %v1094_v23  ;;  %568 = vmatmul.f32.gmra.mxu2 %v983_v17  ;;  %633 = vmatmul.f32.gmra.mxu3 %v986_v22 }
  0xf6   : > { %438 = vmatmul.f32.gmra.mxu0 %v1095_v28  ;;  %503 = vmatmul.f32.gmra.mxu1 %v1098_v29 }
  0xf9   : > { %v987_v40 = vpop.trf.xlu0 }
  0xfa   : > { %v988_v41 = vunpack.i.l.bf16 %v987_v40  ;;  %v991_v46 = vunpack.i.h.bf16 %v987_v40 }
  0xfb   : > { %v1099_v47 = vpop.trf.xlu1 }
  0xfc   : > { %v1100_v52 = vunpack.i.l.bf16 %v1099_v47  ;;  %v1103_v53 = vunpack.i.h.bf16 %v1099_v47  ;;  %571 = vmatmul.f32.gmra.mxu2 %v988_v41  ;;  %636 = vmatmul.f32.gmra.mxu3 %v991_v46 }
  0xfe   : > { %441 = vmatmul.f32.gmra.mxu0 %v1100_v52  ;;  %506 = vmatmul.f32.gmra.mxu1 %v1103_v53 }
 0x101   : > { %v992_v58 = vpop.trf.xlu0 }
 0x102   : > { %v993_v59 = vunpack.i.l.bf16 %v992_v58  ;;  %v996_v3 = vunpack.i.h.bf16 %v992_v58 }
 0x103   : > { %v1104_v5 = vpop.trf.xlu1 }
 0x104   : > { %v1105_v35 = vunpack.i.l.bf16 %v1104_v5  ;;  %v1108_v4 = vunpack.i.h.bf16 %v1104_v5  ;;  %574 = vmatmul.f32.gmra.mxu2 %v993_v59  ;;  %639 = vmatmul.f32.gmra.mxu3 %v996_v3 }
 0x106   : > { %444 = vmatmul.f32.gmra.mxu0 %v1105_v35  ;;  %509 = vmatmul.f32.gmra.mxu1 %v1108_v4 }
 0x109   : > { %v997_v34 = vpop.trf.xlu0 }
 0x10a   : > { %v998_v61 = vunpack.i.l.bf16 %v997_v34  ;;  %v1001_v16 = vunpack.i.h.bf16 %v997_v34 }
 0x10b   : > { %v1109_v2 = vpop.trf.xlu1 }
 0x10c   : > { %v1110_v12 = vunpack.i.l.bf16 %v1109_v2  ;;  %v1113_v13 = vunpack.i.h.bf16 %v1109_v2  ;;  %577 = vmatmul.f32.gmra.mxu2 %v998_v61  ;;  %642 = vmatmul.f32.gmra.mxu3 %v1001_v16 }
 0x10e   : > { %447 = vmatmul.f32.gmra.mxu0 %v1110_v12  ;;  %512 = vmatmul.f32.gmra.mxu1 %v1113_v13 }
 0x111   : > { %v1002_v14 = vpop.trf.xlu0 }
 0x112   : > { %v1003_v15 = vunpack.i.l.bf16 %v1002_v14  ;;  %v1006_v18 = vunpack.i.h.bf16 %v1002_v14 }
 0x113   : > { %v1114_v6 = vpop.trf.xlu1 }
 0x114   : > { %v1115_v8 = vunpack.i.l.bf16 %v1114_v6  ;;  %v1118_v9 = vunpack.i.h.bf16 %v1114_v6  ;;  %580 = vmatmul.f32.gmra.mxu2 %v1003_v15  ;;  %645 = vmatmul.f32.gmra.mxu3 %v1006_v18 }
 0x116   : > { %450 = vmatmul.f32.gmra.mxu0 %v1115_v8  ;;  %515 = vmatmul.f32.gmra.mxu1 %v1118_v9 }
 0x119   : > { %v1007_v19 = vpop.trf.xlu0 }
 0x11a   : > { %v1008_v0 = vunpack.i.l.bf16 %v1007_v19  ;;  %v1011_v20 = vunpack.i.h.bf16 %v1007_v19 }
 0x11b   : > { %v1119_v1 = vpop.trf.xlu1 }
 0x11c   : > { %v1120_v7 = vunpack.i.l.bf16 %v1119_v1  ;;  %v1123_v21 = vunpack.i.h.bf16 %v1119_v1  ;;  %583 = vmatmul.f32.gmra.mxu2 %v1008_v0  ;;  %648 = vmatmul.f32.gmra.mxu3 %v1011_v20 }
 0x11e   : > { %453 = vmatmul.f32.gmra.mxu0 %v1120_v7  ;;  %518 = vmatmul.f32.gmra.mxu1 %v1123_v21 }
 0x121   : > { %v1012_v24 = vpop.trf.xlu0 }
 0x122   : > { %v1013_v25 = vunpack.i.l.bf16 %v1012_v24  ;;  %v1016_v26 = vunpack.i.h.bf16 %v1012_v24 }
 0x123   : > { %v1124_v27 = vpop.trf.xlu1 }
 0x124   : > { %v1125_v30 = vunpack.i.l.bf16 %v1124_v27  ;;  %v1128_v31 = vunpack.i.h.bf16 %v1124_v27  ;;  %586 = vmatmul.f32.gmra.mxu2 %v1013_v25  ;;  %651 = vmatmul.f32.gmra.mxu3 %v1016_v26 }
 0x126   : > { %456 = vmatmul.f32.gmra.mxu0 %v1125_v30  ;;  %521 = vmatmul.f32.gmra.mxu1 %v1128_v31 }
 0x129   : > { %v1017_v32 = vpop.trf.xlu0 }
 0x12a   : > { %v1018_v33 = vunpack.i.l.bf16 %v1017_v32  ;;  %v1021_v36 = vunpack.i.h.bf16 %v1017_v32 }
 0x12b   : > { %v1129_v37 = vpop.trf.xlu1 }
 0x12c   : > { %v1130_v38 = vunpack.i.l.bf16 %v1129_v37  ;;  %v1133_v39 = vunpack.i.h.bf16 %v1129_v37  ;;  %589 = vmatmul.f32.gmra.mxu2 %v1018_v33  ;;  %654 = vmatmul.f32.gmra.mxu3 %v1021_v36 }
 0x12e   : > { %459 = vmatmul.f32.gmra.mxu0 %v1130_v38  ;;  %524 = vmatmul.f32.gmra.mxu1 %v1133_v39 }
 0x131   : > { %v1022_v42 = vpop.trf.xlu0 }
 0x132   : > { %v1023_v43 = vunpack.i.l.bf16 %v1022_v42  ;;  %v1026_v44 = vunpack.i.h.bf16 %v1022_v42 }
 0x133   : > { %v1134_v45 = vpop.trf.xlu1 }
 0x134   : > { %v1135_v48 = vunpack.i.l.bf16 %v1134_v45  ;;  %v1138_v49 = vunpack.i.h.bf16 %v1134_v45  ;;  %592 = vmatmul.f32.gmra.mxu2 %v1023_v43  ;;  %657 = vmatmul.f32.gmra.mxu3 %v1026_v44 }
 0x136   : > { %462 = vmatmul.f32.gmra.mxu0 %v1135_v48  ;;  %527 = vmatmul.f32.gmra.mxu1 %v1138_v49 }
 0x13b   : > { %v418_v50 = vpop.f32.mrf.mxu0  ;;  %v483_v51 = vpop.f32.mrf.mxu1 }
 0x13c   : > { %750 = vmatmul.f32.vlgmr.msrb.gmra.mxu2 %v1163_v54  ;;  %v484_v55 = vadd.f32 %v483_v51, %v418_v50  ;;  %770 = vmatmul.f32.vlgmr.msrb.gmra.mxu3 %v1163_v54 }
 0x13e   : > { %710 = vmatmul.f32.vlgmr.msrb.gmra.mxu0 %v1163_v54  ;;  %730 = vmatmul.f32.vlgmr.msrb.gmra.mxu1 %v1163_v54 }
 0x13f   : > { %v548_v57 = vpop.f32.mrf.mxu2  ;;  %v613_v60 = vpop.f32.mrf.mxu3 }
 0x140   : > { %v549_v62 = vadd.f32 %v548_v57, %v484_v55 }
 0x142   : > { %v614_v63 = vadd.f32 %v613_v60, %v549_v62 }
 0x143   : > { %v421_v10 = vpop.f32.mrf.mxu0  ;;  %v486_v11 = vpop.f32.mrf.mxu1 }
 0x144   : > { %v487_v17 = vadd.f32 %v486_v11, %v421_v10  ;;  %677 = vst [vmem:[%s1601_s23] sm:$0xff] %v614_v63 }
 0x147   : > { %v551_v22 = vpop.f32.mrf.mxu2  ;;  %v616_v23 = vpop.f32.mrf.mxu3 }
 0x148   : > { %v552_v28 = vadd.f32 %v551_v22, %v487_v17 }
 0x14a   : > { %v617_v29 = vadd.f32 %v616_v23, %v552_v28 }
 0x14b   : > { %v424_v40 = vpop.f32.mrf.mxu0  ;;  %v489_v41 = vpop.f32.mrf.mxu1 }
 0x14c   : > { %v490_v46 = vadd.f32 %v489_v41, %v424_v40  ;;  %678 = vst [vmem:[%s1601_s23 + $0x8] sm:$0xff] %v617_v29 }
 0x14f   : > { %v554_v47 = vpop.f32.mrf.mxu2  ;;  %v619_v52 = vpop.f32.mrf.mxu3 }
 0x150   : > { %v555_v53 = vadd.f32 %v554_v47, %v490_v46 }
 0x152   : > { %v620_v58 = vadd.f32 %v619_v52, %v555_v53 }
 0x153   : > { %v427_v59 = vpop.f32.mrf.mxu0  ;;  %v492_v3 = vpop.f32.mrf.mxu1 }
 0x154   : > { %v493_v5 = vadd.f32 %v492_v3, %v427_v59  ;;  %679 = vst [vmem:[%s1601_s23 + $0x10] sm:$0xff] %v620_v58 }
 0x157   : > { %v557_v35 = vpop.f32.mrf.mxu2  ;;  %v622_v4 = vpop.f32.mrf.mxu3 }
 0x158   : > { %v558_v34 = vadd.f32 %v557_v35, %v493_v5 }
 0x15a   : > { %v623_v61 = vadd.f32 %v622_v4, %v558_v34 }
 0x15b   : > { %v430_v16 = vpop.f32.mrf.mxu0  ;;  %v495_v2 = vpop.f32.mrf.mxu1 }
 0x15c   : > { %v496_v12 = vadd.f32 %v495_v2, %v430_v16  ;;  %680 = vst [vmem:[%s1601_s23 + $0x18] sm:$0xff] %v623_v61 }
 0x15f   : > { %v560_v13 = vpop.f32.mrf.mxu2  ;;  %v625_v14 = vpop.f32.mrf.mxu3 }
 0x160   : > { %v561_v15 = vadd.f32 %v560_v13, %v496_v12 }
 0x162   : > { %v626_v18 = vadd.f32 %v625_v14, %v561_v15 }
 0x163   : > { %v433_v6 = vpop.f32.mrf.mxu0  ;;  %v498_v8 = vpop.f32.mrf.mxu1 }
 0x164   : > { %v499_v9 = vadd.f32 %v498_v8, %v433_v6  ;;  %681 = vst [vmem:[%s1601_s23 + $0x20] sm:$0xff] %v626_v18 }
 0x167   : > { %v563_v19 = vpop.f32.mrf.mxu2  ;;  %v628_v0 = vpop.f32.mrf.mxu3 }
 0x168   : > { %v564_v20 = vadd.f32 %v563_v19, %v499_v9 }
 0x16a   : > { %v629_v1 = vadd.f32 %v628_v0, %v564_v20 }
 0x16b   : > { %v436_v7 = vpop.f32.mrf.mxu0  ;;  %v501_v21 = vpop.f32.mrf.mxu1 }
 0x16c   : > { %v502_v24 = vadd.f32 %v501_v21, %v436_v7  ;;  %682 = vst [vmem:[%s1601_s23 + $0x28] sm:$0xff] %v629_v1 }
 0x16f   : > { %v566_v25 = vpop.f32.mrf.mxu2  ;;  %v631_v26 = vpop.f32.mrf.mxu3 }
 0x170   : > { %v567_v27 = vadd.f32 %v566_v25, %v502_v24 }
 0x172   : > { %v632_v30 = vadd.f32 %v631_v26, %v567_v27 }
 0x173   : > { %v439_v31 = vpop.f32.mrf.mxu0  ;;  %v504_v32 = vpop.f32.mrf.mxu1 }
 0x174   : > { %v505_v33 = vadd.f32 %v504_v32, %v439_v31  ;;  %683 = vst [vmem:[%s1601_s23 + $0x30] sm:$0xff] %v632_v30 }
 0x177   : > { %v569_v36 = vpop.f32.mrf.mxu2  ;;  %v634_v37 = vpop.f32.mrf.mxu3 }
 0x178   : > { %v570_v38 = vadd.f32 %v569_v36, %v505_v33 }
 0x17a   : > { %v635_v39 = vadd.f32 %v634_v37, %v570_v38  ;;  %v693_v38 = vld [vmem:[%s1594_s19] sm:$0x1] }
 0x17b   : > { %v442_v42 = vpop.f32.mrf.mxu0  ;;  %v507_v43 = vpop.f32.mrf.mxu1 }
 0x17c   : > { %v508_v44 = vadd.f32 %v507_v43, %v442_v42  ;;  %684 = vst [vmem:[%s1601_s23 + $0x38] sm:$0xff] %v635_v39 }
 0x17f   : > { %v572_v45 = vpop.f32.mrf.mxu2  ;;  %v637_v48 = vpop.f32.mrf.mxu3 }
 0x180   : > { %v573_v49 = vadd.f32 %v572_v45, %v508_v44 }
 0x182   : > { %v638_v50 = vadd.f32 %v637_v48, %v573_v49 }
 0x183   : > { %v445_v51 = vpop.f32.mrf.mxu0  ;;  %v510_v54 = vpop.f32.mrf.mxu1 }
 0x184   : > { %v511_v55 = vadd.f32 %v510_v54, %v445_v51  ;;  %685 = vst [vmem:[%s1601_s23 + $0x40] sm:$0xff] %v638_v50 }
 0x187   : > { %v575_v56 = vpop.f32.mrf.mxu2  ;;  %v640_v57 = vpop.f32.mrf.mxu3 }
 0x188   : > { %v576_v60 = vadd.f32 %v575_v56, %v511_v55 }
 0x18a   : > { %v641_v62 = vadd.f32 %v640_v57, %v576_v60 }
 0x18b   : > { %v448_v63 = vpop.f32.mrf.mxu0  ;;  %v513_v10 = vpop.f32.mrf.mxu1 }
 0x18c   : > { %v514_v11 = vadd.f32 %v513_v10, %v448_v63  ;;  %686 = vst [vmem:[%s1601_s23 + $0x48] sm:$0xff] %v641_v62 }
 0x18f   : > { %v578_v17 = vpop.f32.mrf.mxu2  ;;  %v643_v22 = vpop.f32.mrf.mxu3 }
 0x190   : > { %v579_v23 = vadd.f32 %v578_v17, %v514_v11 }
 0x192   : > { %v644_v28 = vadd.f32 %v643_v22, %v579_v23 }
 0x193   : > { %v451_v29 = vpop.f32.mrf.mxu0  ;;  %v516_v40 = vpop.f32.mrf.mxu1 }
 0x194   : > { %v517_v41 = vadd.f32 %v516_v40, %v451_v29  ;;  %687 = vst [vmem:[%s1601_s23 + $0x50] sm:$0xff] %v644_v28 }
 0x197   : > { %v581_v46 = vpop.f32.mrf.mxu2  ;;  %v646_v47 = vpop.f32.mrf.mxu3 }
 0x198   : > { %v582_v52 = vadd.f32 %v581_v46, %v517_v41 }
 0x19a   : > { %v647_v53 = vadd.f32 %v646_v47, %v582_v52 }
 0x19b   : > { %v454_v58 = vpop.f32.mrf.mxu0  ;;  %v519_v59 = vpop.f32.mrf.mxu1 }
 0x19c   : > { %v520_v3 = vadd.f32 %v519_v59, %v454_v58  ;;  %688 = vst [vmem:[%s1601_s23 + $0x58] sm:$0xff] %v647_v53 }
 0x19f   : > { %v584_v5 = vpop.f32.mrf.mxu2  ;;  %v649_v35 = vpop.f32.mrf.mxu3 }
 0x1a0   : > { %v585_v4 = vadd.f32 %v584_v5, %v520_v3 }
 0x1a2   : > { %v650_v34 = vadd.f32 %v649_v35, %v585_v4 }
 0x1a3   : > { %v457_v61 = vpop.f32.mrf.mxu0  ;;  %v522_v16 = vpop.f32.mrf.mxu1 }
 0x1a4   : > { %v523_v2 = vadd.f32 %v522_v16, %v457_v61  ;;  %689 = vst [vmem:[%s1601_s23 + $0x60] sm:$0xff] %v650_v34 }
 0x1a7   : > { %v587_v12 = vpop.f32.mrf.mxu2  ;;  %v652_v13 = vpop.f32.mrf.mxu3 }
 0x1a8   : > { %v588_v14 = vadd.f32 %v587_v12, %v523_v2 }
 0x1aa   : > { %v653_v15 = vadd.f32 %v652_v13, %v588_v14 }
 0x1ab   : > { %v460_v18 = vpop.f32.mrf.mxu0  ;;  %v525_v6 = vpop.f32.mrf.mxu1 }
 0x1ac   : > { %v526_v8 = vadd.f32 %v525_v6, %v460_v18  ;;  %690 = vst [vmem:[%s1601_s23 + $0x68] sm:$0xff] %v653_v15 }
 0x1af   : > { %v590_v9 = vpop.f32.mrf.mxu2  ;;  %v655_v19 = vpop.f32.mrf.mxu3 }
 0x1b0   : > { %v591_v0 = vadd.f32 %v590_v9, %v526_v8 }
 0x1b2   : > { %v656_v20 = vadd.f32 %v655_v19, %v591_v0 }
 0x1b3   : > { %v463_v1 = vpop.f32.mrf.mxu0  ;;  %v528_v7 = vpop.f32.mrf.mxu1 }
 0x1b4   : > { %v529_v21 = vadd.f32 %v528_v7, %v463_v1  ;;  %691 = vst [vmem:[%s1601_s23 + $0x70] sm:$0xff] %v656_v20 }
 0x1b7   : > { %v593_v24 = vpop.f32.mrf.mxu2  ;;  %v658_v25 = vpop.f32.mrf.mxu3 }
 0x1b8   : > { %v594_v26 = vadd.f32 %v593_v24, %v529_v21 }
 0x1ba   : > { %v659_v27 = vadd.f32 %v658_v25, %v594_v26 }
 0x1bb   : > { %v711_v30 = vpop.f32.mrf.mxu0  ;;  %v731_v31 = vpop.f32.mrf.mxu1 }
 0x1bc   : > { %v732_v32 = vadd.f32 %v731_v31, %v711_v30  ;;  %692 = vst [vmem:[%s1601_s23 + $0x78] sm:$0xff] %v659_v27 }
 0x1bf   : > { %v751_v33 = vpop.f32.mrf.mxu2  ;;  %v771_v36 = vpop.f32.mrf.mxu3 }
 0x1c0   : > { %v752_v37 = vadd.f32 %v751_v33, %v732_v32 }
 0x1c2   : > { %v772_v39 = vadd.f32 %v771_v36, %v752_v37 }
 0x1c4   : > { %v774_v42 = vadd.f32 %v772_v39, %v693_v38 }
 0x1c6   : > { %775 = vst [vmem:[%s1594_s19] sm:$0x1] %v774_v42 }
 0x1c7 PF: > { %s13_s11 = sadd.s32 1, %s1161_s11   ;;  %s1647_s9 = smov %s1157_s10 }
 0x1c8   : > { %p10_p5 = scmp.ge.s32.totalorder %s13_s11, 4   ;;  %s1648_s10 = smov %s1650_s12 }
 0x1ca   :  { %12 = sbr.rel (!%p10_p5) target bundleno = 2 (0x2), region = 70 }

// kernel: cls_head_forward.3
= control target key start
LH: loop header
LB: loop body
LE: loop exit
PB: predicated region body
PF: predicated region fallthrough
CT: control target
= control target key end

     0   :  { %s1331_s18 = smov 0   ;;  %s2516_s0 = inlined_call_operand.vmem [shape: f32[2,16,32,128], index: 0, kind: input, shape index: {}]   ;;  %s2517_s1 = inlined_call_operand.vmem [shape: f32[128,128], index: 1, kind: input, shape index: {}]   ;;  %s2518_s2 = inlined_call_operand.vmem [shape: f32[1,128], index: 2, kind: input, shape index: {}]   ;;  %s2519_s3 = inlined_call_operand.vmem [shape: f32[16,128], index: 3, kind: input, shape index: {}]   ;;  %s2520_s4 = inlined_call_operand.vmem [shape: f32[32,128], index: 4, kind: input, shape index: {}]   ;;  %s2521_s5 = inlined_call_operand.vmem [shape: f32[2,16,128], index: 5, kind: output, shape index: {}]  }
   0x1 LB: > { %s1197_s19 = sadd.s32 4294967295, %s1298_s18   ;;  %p1201_p0 = scmp.ge.s32.totalorder %s1298_s18, 1  ;;  %s1298_s18 = sphi %s1331_s18, %s15_s18  }
   0x2   : > { %p187_p1 = scmp.lt.s32.totalorder %s1298_s18, 3 }
   0x4   : > { %p188_p2 = pnand %p1201_p0, %p187_p1 }
   0x6   : > { %191 = sbr.rel (%p188_p2) target bundleno = 475 (0x1db), region = 40 }
   0xb   : > { %v304_v0 = vld [vmem:[%s2517_s1 + $0x78] sm:$0xff]  ;;  %v303_v1 = vld [vmem:[%s2517_s1 + $0x70] sm:$0xff]  ;;  %v302_v2 = vld [vmem:[%s2517_s1 + $0x68] sm:$0xff]  ;;  %p215_p3 = scmp.lt.s32.totalorder %s1197_s19, 1 }
   0xc   : > { %309 = vmatpush.msra.mxu0 %v304_v0  ;;  %1214 = vmatpush.msra.mxu1 %v304_v0  ;;  %v301_v3 = vld [vmem:[%s2517_s1 + $0x60] sm:$0xff]  ;;  %v300_v4 = vld [vmem:[%s2517_s1 + $0x58] sm:$0xff]  ;;  %v299_v5 = vld [vmem:[%s2517_s1 + $0x50] sm:$0xff] }
   0xd   : > { %1215 = vmatpush.msra.mxu2 %v304_v0  ;;  %1216 = vmatpush.msra.mxu3 %v304_v0  ;;  %v298_v6 = vld [vmem:[%s2517_s1 + $0x48] sm:$0xff]  ;;  %v297_v7 = vld [vmem:[%s2517_s1 + $0x40] sm:$0xff]  ;;  %v296_v8 = vld [vmem:[%s2517_s1 + $0x38] sm:$0xff]  ;;  %s2821_s19 = smov (!%p215_p3, %s1197_s19), 1 }
   0xe   : > { %310 = vmatpush.msra.mxu0 %v303_v1  ;;  %1217 = vmatpush.msra.mxu1 %v303_v1  ;;  %v295_v9 = vld [vmem:[%s2517_s1 + $0x30] sm:$0xff]  ;;  %v294_v10 = vld [vmem:[%s2517_s1 + $0x28] sm:$0xff]  ;;  %v293_v11 = vld [vmem:[%s2517_s1 + $0x20] sm:$0xff]  ;;  %s1212_s23 = sshll.u32 %s2821_s19, 9  ;;  %s1213_s24 = sshll.u32 %s2821_s19, 4 }
   0xf   : > { %1218 = vmatpush.msra.mxu2 %v303_v1  ;;  %1219 = vmatpush.msra.mxu3 %v303_v1  ;;  %v292_v12 = vld [vmem:[%s2517_s1 + $0x18] sm:$0xff]  ;;  %v291_v13 = vld [vmem:[%s2517_s1 + $0x10] sm:$0xff]  ;;  %v290_v14 = vld [vmem:[%s2517_s1 + $0x8] sm:$0xff]  ;;  %s1394_s30 = scalar_lea.vmem %s2516_s0, %s1212_s23  ;;  %s224_s27 = scalar_lea.vmem %s2521_s5, %s1213_s24 }
  0x10   : > { %311 = vmatpush.msra.mxu0 %v302_v2  ;;  %1220 = vmatpush.msra.mxu1 %v302_v2  ;;  %v289_v15 = vld [vmem:[%s2517_s1] sm:$0xff]  ;;  %v226_v20 = vld [vmem:[%s1394_s30 + $0x8] sm:$0xff]  ;;  %v227_v24 = vld [vmem:[%s1394_s30 + $0x10] sm:$0xff] }
  0x11   : > { %1221 = vmatpush.msra.mxu2 %v302_v2  ;;  %1222 = vmatpush.msra.mxu3 %v302_v2  ;;  %v225_v16 = vld [vmem:[%s1394_s30] sm:$0xff]  ;;  %v242_v21 = vld [vmem:[%s1394_s30 + $0x88] sm:$0xff]  ;;  %v243_v25 = vld [vmem:[%s1394_s30 + $0x90] sm:$0xff] }
  0x12   : > { %312 = vmatpush.msra.mxu0 %v301_v3  ;;  %1223 = vmatpush.msra.mxu1 %v301_v3  ;;  %v241_v17 = vld [vmem:[%s1394_s30 + $0x80] sm:$0xff]  ;;  %v258_v22 = vld [vmem:[%s1394_s30 + $0x108] sm:$0xff]  ;;  %v259_v26 = vld [vmem:[%s1394_s30 + $0x110] sm:$0xff] }
  0x13   : > { %1224 = vmatpush.msra.mxu2 %v301_v3  ;;  %1225 = vmatpush.msra.mxu3 %v301_v3  ;;  %v257_v18 = vld [vmem:[%s1394_s30 + $0x100] sm:$0xff]  ;;  %v274_v23 = vld [vmem:[%s1394_s30 + $0x188] sm:$0xff]  ;;  %v275_v27 = vld [vmem:[%s1394_s30 + $0x190] sm:$0xff] }
  0x14   : > { %313 = vmatpush.msra.mxu0 %v300_v4  ;;  %1226 = vmatpush.msra.mxu1 %v300_v4  ;;  %v273_v19 = vld [vmem:[%s1394_s30 + $0x180] sm:$0xff]  ;;  %v228_v28 = vld [vmem:[%s1394_s30 + $0x18] sm:$0xff]  ;;  %v230_v36 = vld [vmem:[%s1394_s30 + $0x28] sm:$0xff] }
  0x15   : > { %1227 = vmatpush.msra.mxu2 %v300_v4  ;;  %1228 = vmatpush.msra.mxu3 %v300_v4  ;;  %v244_v29 = vld [vmem:[%s1394_s30 + $0x98] sm:$0xff]  ;;  %v229_v32 = vld [vmem:[%s1394_s30 + $0x20] sm:$0xff]  ;;  %v246_v37 = vld [vmem:[%s1394_s30 + $0xa8] sm:$0xff] }
  0x16   : > { %314 = vmatpush.msra.mxu0 %v299_v5  ;;  %1229 = vmatpush.msra.mxu1 %v299_v5  ;;  %v260_v30 = vld [vmem:[%s1394_s30 + $0x118] sm:$0xff]  ;;  %v245_v33 = vld [vmem:[%s1394_s30 + $0xa0] sm:$0xff]  ;;  %v262_v38 = vld [vmem:[%s1394_s30 + $0x128] sm:$0xff] }
  0x17   : > { %1230 = vmatpush.msra.mxu2 %v299_v5  ;;  %1231 = vmatpush.msra.mxu3 %v299_v5  ;;  %v276_v31 = vld [vmem:[%s1394_s30 + $0x198] sm:$0xff]  ;;  %v261_v34 = vld [vmem:[%s1394_s30 + $0x120] sm:$0xff]  ;;  %v278_v39 = vld [vmem:[%s1394_s30 + $0x1a8] sm:$0xff] }
  0x18   : > { %315 = vmatpush.msra.mxu0 %v298_v6  ;;  %1232 = vmatpush.msra.mxu1 %v298_v6  ;;  %v277_v35 = vld [vmem:[%s1394_s30 + $0x1a0] sm:$0xff]  ;;  %v231_v40 = vld [vmem:[%s1394_s30 + $0x30] sm:$0xff]  ;;  %v232_v44 = vld [vmem:[%s1394_s30 + $0x38] sm:$0xff] }
  0x19   : > { %1233 = vmatpush.msra.mxu2 %v298_v6  ;;  %1234 = vmatpush.msra.mxu3 %v298_v6  ;;  %v247_v41 = vld [vmem:[%s1394_s30 + $0xb0] sm:$0xff]  ;;  %v248_v45 = vld [vmem:[%s1394_s30 + $0xb8] sm:$0xff]  ;;  %v233_v48 = vld [vmem:[%s1394_s30 + $0x40] sm:$0xff] }
  0x1a   : > { %316 = vmatpush.msra.mxu0 %v297_v7  ;;  %1235 = vmatpush.msra.mxu1 %v297_v7  ;;  %v263_v42 = vld [vmem:[%s1394_s30 + $0x130] sm:$0xff]  ;;  %v264_v46 = vld [vmem:[%s1394_s30 + $0x138] sm:$0xff]  ;;  %v249_v49 = vld [vmem:[%s1394_s30 + $0xc0] sm:$0xff] }
  0x1b   : > { %1236 = vmatpush.msra.mxu2 %v297_v7  ;;  %1237 = vmatpush.msra.mxu3 %v297_v7  ;;  %v279_v43 = vld [vmem:[%s1394_s30 + $0x1b0] sm:$0xff]  ;;  %v280_v47 = vld [vmem:[%s1394_s30 + $0x1b8] sm:$0xff]  ;;  %v265_v50 = vld [vmem:[%s1394_s30 + $0x140] sm:$0xff] }
  0x1c   : > { %317 = vmatpush.msra.mxu0 %v296_v8  ;;  %1238 = vmatpush.msra.mxu1 %v296_v8  ;;  %v281_v51 = vld [vmem:[%s1394_s30 + $0x1c0] sm:$0xff]  ;;  %v234_v52 = vld [vmem:[%s1394_s30 + $0x48] sm:$0xff]  ;;  %v235_v56 = vld [vmem:[%s1394_s30 + $0x50] sm:$0xff] }
  0x1d   : > { %1239 = vmatpush.msra.mxu2 %v296_v8  ;;  %1240 = vmatpush.msra.mxu3 %v296_v8  ;;  %v250_v53 = vld [vmem:[%s1394_s30 + $0xc8] sm:$0xff]  ;;  %v251_v57 = vld [vmem:[%s1394_s30 + $0xd0] sm:$0xff]  ;;  %v236_v60 = vld [vmem:[%s1394_s30 + $0x58] sm:$0xff] }
  0x1e   : > { %318 = vmatpush.msra.mxu0 %v295_v9  ;;  %1241 = vmatpush.msra.mxu1 %v295_v9  ;;  %v266_v54 = vld [vmem:[%s1394_s30 + $0x148] sm:$0xff]  ;;  %v267_v58 = vld [vmem:[%s1394_s30 + $0x150] sm:$0xff]  ;;  %v252_v61 = vld [vmem:[%s1394_s30 + $0xd8] sm:$0xff] }
  0x1f   : > { %1242 = vmatpush.msra.mxu2 %v295_v9  ;;  %1243 = vmatpush.msra.mxu3 %v295_v9  ;;  %v282_v55 = vld [vmem:[%s1394_s30 + $0x1c8] sm:$0xff]  ;;  %v283_v59 = vld [vmem:[%s1394_s30 + $0x1d0] sm:$0xff]  ;;  %v268_v62 = vld [vmem:[%s1394_s30 + $0x158] sm:$0xff] }
  0x20   : > { %319 = vmatpush.msra.mxu0 %v294_v10  ;;  %1244 = vmatpush.msra.mxu1 %v294_v10  ;;  %v284_v63 = vld [vmem:[%s1394_s30 + $0x1d8] sm:$0xff]  ;;  %v237_v0 = vld [vmem:[%s1394_s30 + $0x60] sm:$0xff]  ;;  %v238_v4 = vld [vmem:[%s1394_s30 + $0x68] sm:$0xff] }
  0x21   : > { %1245 = vmatpush.msra.mxu2 %v294_v10  ;;  %1246 = vmatpush.msra.mxu3 %v294_v10  ;;  %v253_v1 = vld [vmem:[%s1394_s30 + $0xe0] sm:$0xff]  ;;  %v254_v5 = vld [vmem:[%s1394_s30 + $0xe8] sm:$0xff]  ;;  %v239_v8 = vld [vmem:[%s1394_s30 + $0x70] sm:$0xff] }
  0x22   : > { %320 = vmatpush.msra.mxu0 %v293_v11  ;;  %1247 = vmatpush.msra.mxu1 %v293_v11  ;;  %v269_v2 = vld [vmem:[%s1394_s30 + $0x160] sm:$0xff]  ;;  %v270_v6 = vld [vmem:[%s1394_s30 + $0x168] sm:$0xff]  ;;  %v255_v9 = vld [vmem:[%s1394_s30 + $0xf0] sm:$0xff] }
  0x23   : > { %1248 = vmatpush.msra.mxu2 %v293_v11  ;;  %1249 = vmatpush.msra.mxu3 %v293_v11  ;;  %v285_v3 = vld [vmem:[%s1394_s30 + $0x1e0] sm:$0xff]  ;;  %v286_v7 = vld [vmem:[%s1394_s30 + $0x1e8] sm:$0xff]  ;;  %v271_v10 = vld [vmem:[%s1394_s30 + $0x170] sm:$0xff] }
  0x24   : > { %321 = vmatpush.msra.mxu0 %v292_v12  ;;  %1250 = vmatpush.msra.mxu1 %v292_v12  ;;  %v287_v11 = vld [vmem:[%s1394_s30 + $0x1f0] sm:$0xff] }
  0x25   : > { %1251 = vmatpush.msra.mxu2 %v292_v12  ;;  %1252 = vmatpush.msra.mxu3 %v292_v12  ;;  %v240_v12 = vld [vmem:[%s1394_s30 + $0x78] sm:$0xff] }
  0x26   : > { %322 = vmatpush.msra.mxu0 %v291_v13  ;;  %1253 = vmatpush.msra.mxu1 %v291_v13 }
  0x27   : > { %1254 = vmatpush.msra.mxu2 %v291_v13  ;;  %1255 = vmatpush.msra.mxu3 %v291_v13  ;;  %v256_v13 = vld [vmem:[%s1394_s30 + $0xf8] sm:$0xff] }
  0x28   : > { %323 = vmatpush.msra.mxu0 %v290_v14  ;;  %1256 = vmatpush.msra.mxu1 %v290_v14 }
  0x29   : > { %1257 = vmatpush.msra.mxu2 %v290_v14  ;;  %1258 = vmatpush.msra.mxu3 %v290_v14  ;;  %v272_v14 = vld [vmem:[%s1394_s30 + $0x178] sm:$0xff] }
  0x2a   : > { %324 = vmatpush.msra.mxu0 %v289_v15  ;;  %1259 = vmatpush.msra.mxu1 %v289_v15 }
  0x2b   : > { %325 = vmatmul.f32.vlgmr.msra.gmra.mxu0 %v225_v16  ;;  %373 = vmatmul.f32.vlgmr.msra.gmra.mxu1 %v241_v17 }
  0x2c   : > { %1260 = vmatpush.msra.mxu2 %v289_v15  ;;  %1261 = vmatpush.msra.mxu3 %v289_v15  ;;  %v288_v15 = vld [vmem:[%s1394_s30 + $0x1f8] sm:$0xff] }
  0x2d   : > { %421 = vmatmul.f32.vlgmr.msra.gmra.mxu2 %v257_v18  ;;  %469 = vmatmul.f32.vlgmr.msra.gmra.mxu3 %v273_v19 }
  0x33   : > { %328 = vmatmul.f32.gmra.mxu0 %v226_v20  ;;  %376 = vmatmul.f32.gmra.mxu1 %v242_v21 }
  0x35   : > { %424 = vmatmul.f32.gmra.mxu2 %v258_v22  ;;  %472 = vmatmul.f32.gmra.mxu3 %v274_v23 }
  0x3b   : > { %331 = vmatmul.f32.gmra.mxu0 %v227_v24  ;;  %379 = vmatmul.f32.gmra.mxu1 %v243_v25 }
  0x3d   : > { %427 = vmatmul.f32.gmra.mxu2 %v259_v26  ;;  %475 = vmatmul.f32.gmra.mxu3 %v275_v27 }
  0x43   : > { %334 = vmatmul.f32.gmra.mxu0 %v228_v28  ;;  %382 = vmatmul.f32.gmra.mxu1 %v244_v29 }
  0x45   : > { %430 = vmatmul.f32.gmra.mxu2 %v260_v30  ;;  %478 = vmatmul.f32.gmra.mxu3 %v276_v31 }
  0x4b   : > { %337 = vmatmul.f32.gmra.mxu0 %v229_v32  ;;  %385 = vmatmul.f32.gmra.mxu1 %v245_v33 }
  0x4d   : > { %433 = vmatmul.f32.gmra.mxu2 %v261_v34  ;;  %481 = vmatmul.f32.gmra.mxu3 %v277_v35 }
  0x53   : > { %340 = vmatmul.f32.gmra.mxu0 %v230_v36  ;;  %388 = vmatmul.f32.gmra.mxu1 %v246_v37 }
  0x55   : > { %436 = vmatmul.f32.gmra.mxu2 %v262_v38  ;;  %484 = vmatmul.f32.gmra.mxu3 %v278_v39 }
  0x5b   : > { %343 = vmatmul.f32.gmra.mxu0 %v231_v40  ;;  %391 = vmatmul.f32.gmra.mxu1 %v247_v41 }
  0x5d   : > { %439 = vmatmul.f32.gmra.mxu2 %v263_v42  ;;  %487 = vmatmul.f32.gmra.mxu3 %v279_v43 }
  0x63   : > { %346 = vmatmul.f32.gmra.mxu0 %v232_v44  ;;  %394 = vmatmul.f32.gmra.mxu1 %v248_v45 }
  0x65   : > { %442 = vmatmul.f32.gmra.mxu2 %v264_v46  ;;  %490 = vmatmul.f32.gmra.mxu3 %v280_v47 }
  0x6b   : > { %349 = vmatmul.f32.gmra.mxu0 %v233_v48  ;;  %397 = vmatmul.f32.gmra.mxu1 %v249_v49 }
  0x6d   : > { %445 = vmatmul.f32.gmra.mxu2 %v265_v50  ;;  %493 = vmatmul.f32.gmra.mxu3 %v281_v51  ;;  %v1510_v50 = vld [vmem:[%s2518_s2] ss:$0 sm:$0xff] }
  0x6e   : > { %v1515_v51 = vld [vmem:[%s2519_s3] sm:$0xff] }
  0x73   : > { %352 = vmatmul.f32.gmra.mxu0 %v234_v52  ;;  %400 = vmatmul.f32.gmra.mxu1 %v250_v53 }
  0x75   : > { %448 = vmatmul.f32.gmra.mxu2 %v266_v54  ;;  %496 = vmatmul.f32.gmra.mxu3 %v282_v55  ;;  %v589_v54 = vrot.slane %v1515_v51, 4 }
  0x7b   : > { %355 = vmatmul.f32.gmra.mxu0 %v235_v56  ;;  %403 = vmatmul.f32.gmra.mxu1 %v251_v57  ;;  %v1531_v57 = vld [vmem:[%s2519_s3 + $0x8] sm:$0xff] }
  0x7d   : > { %451 = vmatmul.f32.gmra.mxu2 %v267_v58  ;;  %499 = vmatmul.f32.gmra.mxu3 %v283_v59 }
  0x83   : > { %358 = vmatmul.f32.gmra.mxu0 %v236_v60  ;;  %406 = vmatmul.f32.gmra.mxu1 %v252_v61  ;;  %v1538_v60 = vperm.slane %v1515_v51, 0 }
  0x85   : > { %454 = vmatmul.f32.gmra.mxu2 %v268_v62  ;;  %502 = vmatmul.f32.gmra.mxu3 %v284_v63  ;;  %v596_v62 = vrot.slane %v1531_v57, 4 }
  0x8b   : > { %361 = vmatmul.f32.gmra.mxu0 %v237_v0  ;;  %409 = vmatmul.f32.gmra.mxu1 %v253_v1  ;;  %v604_v1 = vperm.slane %v589_v54, 0 }
  0x8d   : > { %457 = vmatmul.f32.gmra.mxu2 %v269_v2  ;;  %505 = vmatmul.f32.gmra.mxu3 %v285_v3  ;;  %v586_v2 = vrot.slane %v1515_v51, 1 }
  0x93   : > { %364 = vmatmul.f32.gmra.mxu0 %v238_v4  ;;  %412 = vmatmul.f32.gmra.mxu1 %v254_v5 }
  0x95   : > { %460 = vmatmul.f32.gmra.mxu2 %v270_v6  ;;  %508 = vmatmul.f32.gmra.mxu3 %v286_v7  ;;  %v1560_v7 = vperm.slane %v1531_v57, 0 }
  0x9b   : > { %367 = vmatmul.f32.gmra.mxu0 %v239_v8  ;;  %415 = vmatmul.f32.gmra.mxu1 %v255_v9  ;;  %v590_v8 = vrot.slane %v1515_v51, 5 }
  0x9d   : > { %463 = vmatmul.f32.gmra.mxu2 %v271_v10  ;;  %511 = vmatmul.f32.gmra.mxu3 %v287_v11  ;;  %v1601_v54 = vperm.slane %v590_v8, 0 }
  0xa3   : > { %370 = vmatmul.f32.gmra.mxu0 %v240_v12  ;;  %418 = vmatmul.f32.gmra.mxu1 %v256_v13  ;;  %v1570_v12 = vperm.slane %v596_v62, 0 }
  0xa5   : > { %466 = vmatmul.f32.gmra.mxu2 %v272_v14  ;;  %514 = vmatmul.f32.gmra.mxu3 %v288_v15  ;;  %2595 = vst [vmem:[#allocation11_spill] sm:$0xff] %v1570_v12  ;;  %v1581_v15 = vperm.slane %v586_v2, 0 }
  0xa8   : > { %v326_v16 = vpop.f32.mrf.mxu0  ;;  %v374_v17 = vpop.f32.mrf.mxu1 }
  0xa9   : > { %v1518_v52 = vadd.f32 %v1510_v50, %v326_v16  ;;  %v1521_v53 = vadd.f32 %v1510_v50, %v374_v17 }
  0xab   : > { %2586 = vst [vmem:[#allocation2_spill] sm:$0xff] %v1518_v52  ;;  %v2523_v63 = vmax.f32 %v1518_v52, 0.0  ;;  %v2522_v0 = vmax.f32 %v1521_v53, 0.0 }
  0xac   : > { %2587 = vst [vmem:[#allocation3_spill] sm:$0xff] %v1521_v53 }
  0xad   : > { %v1575_v13 = vmul.f32 %v1538_v60, %v2523_v63  ;;  %v1579_v14 = vmul.f32 %v604_v1, %v2522_v0 }
  0xb0   : > { %v329_v18 = vpop.f32.mrf.mxu0  ;;  %v377_v19 = vpop.f32.mrf.mxu1 }
  0xb1   : > { %v422_v20 = vpop.f32.mrf.mxu2  ;;  %v470_v21 = vpop.f32.mrf.mxu3  ;;  %v1541_v61 = vadd.f32 %v1510_v50, %v329_v18  ;;  %v1548_v3 = vadd.f32 %v1510_v50, %v377_v19 }
  0xb2   : > { %v1551_v4 = vadd.f32 %v1510_v50, %v422_v20  ;;  %v1554_v5 = vadd.f32 %v1510_v50, %v470_v21  ;;  %v593_v20 = vrot.slane %v1531_v57, 1 }
  0xb3   : > { %2588 = vst [vmem:[#allocation4_spill] sm:$0xff] %v1541_v61  ;;  %v2524_v9 = vmax.f32 %v1541_v61, 0.0  ;;  %v2526_v17 = vmax.f32 %v1548_v3, 0.0 }
  0xb4   : > { %2589 = vst [vmem:[#allocation5_spill] sm:$0xff] %v1548_v3  ;;  %v2528_v18 = vmax.f32 %v1551_v4, 0.0  ;;  %v1642_v8 = vperm.slane %v593_v20, 0  ;;  %v587_v3 = vrot.slane %v1515_v51, 2 }
  0xb5   : > { %2590 = vst [vmem:[#allocation6_spill] sm:$0xff] %v1551_v4  ;;  %v1610_v0 = vmul.f32 %v1538_v60, %v2524_v9  ;;  %v597_v9 = vrot.slane %v1531_v57, 5  ;;  %v1630_v63 = vmul.f32 %v604_v1, %v2526_v17 }
  0xb6   : > { %2591 = vst [vmem:[#allocation7_spill] sm:$0xff] %v1554_v5 }
  0xb8   : > { %v332_v22 = vpop.f32.mrf.mxu0  ;;  %v380_v23 = vpop.f32.mrf.mxu1 }
  0xb9   : > { %v425_v24 = vpop.f32.mrf.mxu2  ;;  %v473_v25 = vpop.f32.mrf.mxu3  ;;  %v1557_v6 = vadd.f32 %v1510_v50, %v332_v22  ;;  %v1565_v10 = vadd.f32 %v1510_v50, %v380_v23 }
  0xba   : > { %v1568_v11 = vadd.f32 %v1510_v50, %v425_v24  ;;  %v1584_v16 = vadd.f32 %v1510_v50, %v473_v25 }
  0xbb   : > { %2592 = vst [vmem:[#allocation8_spill] sm:$0xff] %v1557_v6 }
  0xbc   : > { %2593 = vst [vmem:[#allocation9_spill] sm:$0xff] %v1565_v10  ;;  %v2607_v20 = vmax.f32 %v1568_v11, 0.0 }
  0xbd   : > { %2594 = vst [vmem:[#allocation10_spill] sm:$0xff] %v1568_v11 }
  0xbe   : > { %2596 = vst [vmem:[#allocation12_spill] sm:$0xff] %v1584_v16 }
  0xc0   : > { %v335_v26 = vpop.f32.mrf.mxu0  ;;  %v383_v27 = vpop.f32.mrf.mxu1 }
  0xc1   : > { %v1463_v28 = vpop.f32.mrf.mxu2  ;;  %v1465_v29 = vpop.f32.mrf.mxu3  ;;  %v1596_v24 = vadd.f32 %v1510_v50, %v335_v26  ;;  %v1599_v25 = vadd.f32 %v1510_v50, %v383_v27 }
  0xc2   : > { %v1616_v26 = vadd.f32 %v1510_v50, %v1463_v28  ;;  %v1625_v19 = vadd.f32 %v1510_v50, %v1465_v29  ;;  %v1635_v28 = vmul.f32 %v1560_v7, %v2528_v18  ;;  %v2604_v29 = vmax.f32 %v1557_v6, 0.0 }
  0xc3   : > { %2597 = vst [vmem:[#allocation13_spill] sm:$0xff] %v1596_v24 }
  0xc4   : > { %2598 = vst [vmem:[#allocation14_spill] sm:$0xff] %v1599_v25  ;;  %v1647_v53 = vmul.f32 %v1538_v60, %v2604_v29 }
  0xc5   : > { %2599 = vst [vmem:[#allocation15_spill] sm:$0xff] %v1616_v26 }
  0xc6   : > { %2601 = vst [vmem:[#allocation17_spill] sm:$0xff] %v1625_v19 }
  0xc8   : > { %v1467_v30 = vpop.f32.mrf.mxu0  ;;  %v1469_v31 = vpop.f32.mrf.mxu1 }
  0xc9   : > { %v1471_v32 = vpop.f32.mrf.mxu2  ;;  %v1473_v33 = vpop.f32.mrf.mxu3  ;;  %v1620_v27 = vadd.f32 %v1510_v50, %v1467_v30  ;;  %v2602_v30 = vmax.f32 %v1554_v5, 0.0  ;;  %v1653_v18 = vadd.f32 %v1510_v50, %v1469_v31  ;;  %v2606_v5 = vmax.f32 %v1565_v10, 0.0 }
  0xca   : > { %v1667_v17 = vadd.f32 %v1510_v50, %v1471_v32  ;;  %v2609_v31 = vmax.f32 %v1584_v16, 0.0  ;;  %v1676_v10 = vperm.slane %v597_v9, 0  ;;  %v1688_v32 = vadd.f32 %v1510_v50, %v1473_v33 }
  0xcb   : > { %2600 = vst [vmem:[#allocation16_spill] sm:$0xff] %v1620_v27  ;;  %v1640_v23 = vmul.f32 %v1570_v12, %v2602_v30  ;;  %v1657_v4 = vmul.f32 %v604_v1, %v2606_v5  ;;  %v1662_v30 = vmul.f32 %v1560_v7, %v2607_v20  ;;  %v2613_v9 = vmax.f32 %v1596_v24, 0.0 }
  0xcc   : > { %2605 = vst [vmem:[#allocation19_spill] sm:$0xff] %v1653_v18  ;;  %v1673_v6 = vmul.f32 %v1570_v12, %v2609_v31 }
  0xcd   : > { %2603 = vst [vmem:[#allocation18_spill] sm:$0xff] %v1640_v23  ;;  %v1698_v5 = vmul.f32 %v1538_v60, %v2613_v9  ;;  %v2616_v23 = vmax.f32 %v1616_v26, 0.0  ;;  %v2625_v60 = vmax.f32 %v1667_v17, 0.0 }
  0xce   : > { %2608 = vst [vmem:[#allocation20_spill] sm:$0xff] %v1667_v17 }
  0xcf   : > { %2612 = vst [vmem:[#allocation23_spill] sm:$0xff] %v1688_v32  ;;  %v1716_v24 = vmul.f32 %v1560_v7, %v2616_v23 }
  0xd0   : > { %v1475_v34 = vpop.f32.mrf.mxu0  ;;  %v1477_v35 = vpop.f32.mrf.mxu1 }
  0xd1   : > { %v1479_v36 = vpop.f32.mrf.mxu2  ;;  %v1481_v37 = vpop.f32.mrf.mxu3  ;;  %v1680_v20 = vadd.f32 %v1510_v50, %v1475_v34  ;;  %v1684_v29 = vadd.f32 %v1510_v50, %v1477_v35  ;;  %v2614_v34 = vmax.f32 %v1599_v25, 0.0  ;;  %v2620_v35 = vmax.f32 %v1625_v19, 0.0 }
  0xd2   : > { %v1725_v9 = vadd.f32 %v1510_v50, %v1481_v37  ;;  %v1759_v37 = vmul.f32 %v1560_v7, %v2625_v60 }
  0xd3   : > { %2610 = vst [vmem:[#allocation21_spill] sm:$0xff] %v1680_v20  ;;  %v1702_v11 = vmul.f32 %v604_v1, %v2614_v34  ;;  %v1721_v1 = vadd.f32 %v1510_v50, %v1479_v36  ;;  %v1733_v26 = vmul.f32 %v1570_v12, %v2620_v35  ;;  %v591_v36 = vrot.slane %v1515_v51, 6 }
  0xd4   : > { %2611 = vst [vmem:[#allocation22_spill] sm:$0xff] %v1684_v29  ;;  %v588_v12 = vrot.slane %v1515_v51, 3  ;;  %v2629_v7 = vmax.f32 %v1680_v20, 0.0 }
  0xd5   : > { %2617 = vst [vmem:[#allocation25_spill] sm:$0xff] %v1721_v1  ;;  %v1773_v17 = vperm.slane %v591_v36, 0 }
  0xd6   : > { %2618 = vst [vmem:[#allocation26_spill] sm:$0xff] %v1725_v9  ;;  %v637_v60 = vmul.f32 %v1581_v15, %v2629_v7 }
  0xd7   : > { %2621 = vst [vmem:[#allocation27_spill] sm:$0xff] %v1733_v26 }
  0xd8   : > { %v1483_v38 = vpop.f32.mrf.mxu0  ;;  %v1485_v39 = vpop.f32.mrf.mxu1  ;;  %2626 = vst [vmem:[#allocation30_spill] sm:$0xff] %v1759_v37 }
  0xd9   : > { %v1487_v40 = vpop.f32.mrf.mxu2  ;;  %v1489_v41 = vpop.f32.mrf.mxu3  ;;  %v1737_v23 = vadd.f32 %v1510_v50, %v1483_v38  ;;  %v1752_v35 = vadd.f32 %v1510_v50, %v1485_v39 }
  0xda   : > { %v1764_v25 = vadd.f32 %v1510_v50, %v1487_v40  ;;  %v1771_v38 = vadd.f32 %v1510_v50, %v1489_v41 }
  0xdb   : > { %2622 = vst [vmem:[#allocation28_spill] sm:$0xff] %v1737_v23 }
  0xdc   : > { %2624 = vst [vmem:[#allocation29_spill] sm:$0xff] %v1752_v35 }
  0xdd   : > { %2627 = vst [vmem:[#allocation31_spill] sm:$0xff] %v1764_v25 }
  0xde   : > { %2628 = vst [vmem:[#allocation32_spill] sm:$0xff] %v1771_v38 }
  0xe0   : > { %v1491_v42 = vpop.f32.mrf.mxu0  ;;  %v1493_v43 = vpop.f32.mrf.mxu1 }
  0xe1   : > { %v1495_v44 = vpop.f32.mrf.mxu2  ;;  %v1497_v45 = vpop.f32.mrf.mxu3  ;;  %v1808_v36 = vadd.f32 %v1510_v50, %v1491_v42 }
  0xe3   : > { %2635 = vst [vmem:[#allocation35_spill] sm:$0xff] %v1808_v36 }
  0xe8   : > { %v1499_v46 = vpop.f32.mrf.mxu0  ;;  %v1501_v47 = vpop.f32.mrf.mxu1 }
  0xe9   : > { %v1503_v48 = vpop.f32.mrf.mxu2  ;;  %v1505_v49 = vpop.f32.mrf.mxu3  ;;  %v1707_v33 = vadd.f32 %v1510_v50, %v1499_v46  ;;  %v2619_v46 = vmax.f32 %v1620_v27, 0.0  ;;  %v1743_v27 = vperm.slane %v587_v3, 0  ;;  %v2630_v3 = vmax.f32 %v1684_v29, 0.0 }
  0xea   : > { %v1795_v29 = vperm.slane %v588_v12, 0 }
  0xeb   : > { %2615 = vst [vmem:[#allocation24_spill] sm:$0xff] %v1707_v33  ;;  %v636_v34 = vmul.f32 %v1581_v15, %v2619_v46  ;;  %v2623_v46 = vmax.f32 %v1653_v18, 0.0  ;;  %v1781_v40 = vmul.f32 %v1601_v54, %v2630_v3 }
  0xed   : > { %v1748_v19 = vmul.f32 %v1601_v54, %v2623_v46  ;;  %v696_v39 = vadd.f32 %v636_v34, %v1575_v13  ;;  %v594_v34 = vrot.slane %v1531_v57, 2  ;;  %v2631_v46 = vmax.f32 %v1707_v33, 0.0 }
  0xee   : > { %v2638_v33 = vmax.f32 %v1737_v23, 0.0  ;;  %v2639_v23 = vmax.f32 %v1752_v35, 0.0 }
  0xef   : > { %v640_v20 = vmul.f32 %v1743_v27, %v2631_v46 }
  0xf0   : > { %v1524_v55 = vpop.f32.mrf.mxu0  ;;  %v1526_v56 = vpop.f32.mrf.mxu1  ;;  %v638_v37 = vmul.f32 %v1581_v15, %v2638_v33  ;;  %v1833_v33 = vmul.f32 %v1601_v54, %v2639_v23 }
  0xf1   : > { %v1533_v58 = vpop.f32.mrf.mxu2  ;;  %v1535_v59 = vpop.f32.mrf.mxu3  ;;  %v1785_v13 = vadd.f32 %v1510_v50, %v1524_v55  ;;  %v2634_v55 = vmax.f32 %v1721_v1, 0.0  ;;  %v697_v1 = vadd.f32 %v696_v39, %v640_v20  ;;  %v1853_v20 = vadd.f32 %v1510_v50, %v1495_v44 }
  0xf2   : > { %v1856_v23 = vadd.f32 %v638_v37, %v1647_v53  ;;  %v2643_v39 = vmax.f32 %v1771_v38, 0.0  ;;  %v598_v44 = vrot.slane %v1531_v57, 6 }
  0xf3   : > { %v1804_v26 = vmul.f32 %v1642_v8, %v2634_v55  ;;  %v1822_v55 = vadd.f32 %v1510_v50, %v1501_v47  ;;  %v2555_v46 = vmax.f32 %v1785_v13, 0.0  ;;  %2642 = vst [vmem:[#allocation38_spill] sm:$0xff] %v1853_v20 }
  0xf8   : > { %v1590_v21 = vpop.f32.mrf.mxu0  ;;  %v1592_v22 = vpop.f32.mrf.mxu1 }
  0xf9   : > { %v1603_v62 = vpop.f32.mrf.mxu2  ;;  %v1605_v2 = vpop.f32.mrf.mxu3 }
 0x100   : > { %v1691_v31 = vpop.f32.mrf.mxu0  ;;  %v1693_v16 = vpop.f32.mrf.mxu1 }
 0x101   : > { %v1709_v61 = vpop.f32.mrf.mxu2  ;;  %v1711_v52 = vpop.f32.mrf.mxu3 }
 0x108   : > { %v362_v18 = vpop.f32.mrf.mxu0  ;;  %v410_v41 = vpop.f32.mrf.mxu1 }
 0x109   : > { %v1793_v7 = vadd.f32 %v1510_v50, %v362_v18  ;;  %v1797_v3 = vpop.f32.mrf.mxu2  ;;  %v1799_v32 = vpop.f32.mrf.mxu3  ;;  %v2636_v18 = vmax.f32 %v1725_v9, 0.0  ;;  %v1827_v9 = vperm.slane %v594_v34, 0 }
 0x10a   : > { %2633 = vst [vmem:[#allocation34_spill] sm:$0xff] %v1799_v32  ;;  %v711_v32 = vadd.f32 %v637_v60, %v1610_v0  ;;  %v2641_v60 = vmax.f32 %v1764_v25, 0.0  ;;  %v1869_v0 = vadd.f32 %v1510_v50, %v1526_v56  ;;  %v2645_v25 = vmax.f32 %v1808_v36, 0.0 }
 0x10b   : > { %2632 = vst [vmem:[#allocation33_spill] sm:$0xff] %v1793_v7  ;;  %v1814_v12 = vmul.f32 %v1676_v10, %v2636_v18  ;;  %v2553_v42 = vmax.f32 %v1793_v7, 0.0  ;;  %v592_v18 = vrot.slane %v1515_v51, 7  ;;  %v1849_v51 = vadd.f32 %v1510_v50, %v1493_v43 }
 0x10c   : > { %v1845_v34 = vmul.f32 %v1642_v8, %v2641_v60  ;;  %v641_v43 = vmul.f32 %v1743_v27, %v2555_v46  ;;  %2644 = vst [vmem:[#allocation39_spill] sm:$0xff] %v1869_v0  ;;  %v2650_v7 = vmax.f32 %v1853_v20, 0.0 }
 0x10d   : > { %2637 = vst [vmem:[#allocation36_spill] sm:$0xff] %v1814_v12  ;;  %v644_v47 = vmul.f32 %v1795_v29, %v2553_v42  ;;  %v1839_v12 = vadd.f32 %v1510_v50, %v410_v41  ;;  %v1861_v41 = vmul.f32 %v1676_v10, %v2643_v39  ;;  %v1872_v37 = vperm.slane %v592_v18, 0 }
 0x10e   : > { %v1876_v39 = vadd.f32 %v1510_v50, %v1590_v21  ;;  %v639_v18 = vmul.f32 %v1581_v15, %v2645_v25  ;;  %v2561_v35 = vmax.f32 %v1849_v51, 0.0  ;;  %v1892_v21 = vadd.f32 %v1510_v50, %v1497_v45 }
 0x10f   : > { %2640 = vst [vmem:[#allocation37_spill] sm:$0xff] %v1839_v12  ;;  %v698_v60 = vadd.f32 %v697_v1, %v644_v47  ;;  %v712_v15 = vadd.f32 %v711_v32, %v641_v43  ;;  %v1904_v25 = vadd.f32 %v1510_v50, %v1503_v48  ;;  %v1909_v45 = vadd.f32 %v1510_v50, %v1533_v58 }
 0x110   : > { %v365_v53 = vpop.f32.mrf.mxu0  ;;  %v413_v38 = vpop.f32.mrf.mxu1  ;;  %v1921_v48 = vmul.f32 %v1601_v54, %v2561_v35  ;;  %v1926_v58 = vadd.f32 %v1510_v50, %v1592_v22  ;;  %v2651_v35 = vmax.f32 %v1869_v0, 0.0  ;;  %v1956_v22 = vadd.f32 %v1510_v50, %v1603_v62 }
 0x111   : > { %v699_v1 = vadd.f32 %v698_v60, %v1579_v14  ;;  %v1880_v47 = vadd.f32 %v1510_v50, %v365_v53  ;;  %v458_v42 = vpop.f32.mrf.mxu2  ;;  %v1883_v56 = vpop.f32.mrf.mxu3  ;;  %v2646_v14 = vmax.f32 %v1822_v55, 0.0  ;;  %v1900_v36 = vadd.f32 %v1510_v50, %v413_v38  ;;  %2648 = vst [vmem:[#allocation41_spill] sm:$0xff] %v1909_v45 }
 0x112   : > { %v2649_v38 = vmax.f32 %v1839_v12, 0.0  ;;  %2653 = vst [vmem:[#allocation42_spill] sm:$0xff] %v1956_v22  ;;  %v2656_v62 = vmax.f32 %v1909_v45, 0.0  ;;  %v2658_v0 = vmax.f32 %v1926_v58, 0.0 }
 0x113   : > { %v656_v60 = vmul.f32 %v1773_v17, %v2646_v14  ;;  %v2560_v53 = vmax.f32 %v1880_v47, 0.0  ;;  %v700_v46 = vadd.f32 %v699_v1, %v1748_v19  ;;  %2647 = vst [vmem:[#allocation40_spill] sm:$0xff] %v1900_v36  ;;  %v1928_v14 = vperm.slane %v598_v44, 0 }
 0x114   : > { %v660_v32 = vmul.f32 %v1872_v37, %v2649_v38  ;;  %v1934_v38 = vmul.f32 %v1642_v8, %v2650_v7  ;;  %v657_v1 = vmul.f32 %v1773_v17, %v2651_v35  ;;  %v1944_v44 = vadd.f32 %v1510_v50, %v1691_v31 }
 0x115   : > { %v645_v19 = vmul.f32 %v1795_v29, %v2560_v53  ;;  %v701_v43 = vadd.f32 %v700_v46, %v656_v60  ;;  %v741_v53 = vadd.f32 %v639_v18, %v1698_v5  ;;  %v2652_v7 = vmax.f32 %v1876_v39, 0.0 }
 0x116   : > { %v595_v31 = vrot.slane %v1531_v57, 3  ;;  %v672_v35 = vmul.f32 %v1827_v9, %v2656_v62  ;;  %v2567_v62 = vmax.f32 %v1956_v22, 0.0 }
 0x117   : > { %v713_v46 = vadd.f32 %v712_v15, %v645_v19  ;;  %v642_v15 = vmul.f32 %v1743_v27, %v2652_v7  ;;  %v702_v60 = vadd.f32 %v701_v43, %v660_v32  ;;  %v1978_v7 = vadd.f32 %v1510_v50, %v1535_v59 }
 0x118   : > { %v368_v5 = vpop.f32.mrf.mxu0  ;;  %v416_v18 = vpop.f32.mrf.mxu1  ;;  %v1993_v59 = vperm.slane %v595_v31, 0  ;;  %v2009_v31 = vadd.f32 %v1510_v50, %v1709_v61 }
 0x119   : > { %v714_v19 = vadd.f32 %v713_v46, %v1630_v63  ;;  %v1951_v54 = vadd.f32 %v1510_v50, %v368_v5  ;;  %v461_v20 = vpop.f32.mrf.mxu2  ;;  %v1960_v12 = vadd.f32 %v1510_v50, %v416_v18  ;;  %v2654_v63 = vmax.f32 %v1900_v36, 0.0  ;;  %v1970_v5 = vpop.f32.mrf.mxu3 }
 0x11a   : > { %v1968_v46 = vadd.f32 %v1510_v50, %v461_v20  ;;  %v1981_v36 = vadd.f32 %v1510_v50, %v458_v42  ;;  %v703_v20 = vadd.f32 %v702_v60, %v1635_v28  ;;  %v1991_v18 = vadd.f32 %v1510_v50, %v1605_v2 }
 0x11b   : > { %v661_v32 = vmul.f32 %v1872_v37, %v2654_v63  ;;  %v715_v43 = vadd.f32 %v714_v19, %v1781_v40  ;;  %v727_v40 = vadd.f32 %v1856_v23, %v642_v15  ;;  %v2657_v19 = vmax.f32 %v1951_v54, 0.0 }
 0x11c   : > { %2655 = vst [vmem:[#allocation43_spill] sm:$0xff] %v1968_v46  ;;  %v658_v23 = vmul.f32 %v1773_v17, %v2658_v0  ;;  %v2570_v15 = vmax.f32 %v1968_v46, 0.0  ;;  %v2005_v2 = vadd.f32 %v1510_v50, %v1693_v16  ;;  %v673_v16 = vmul.f32 %v1827_v9, %v2567_v62 }
 0x11d   : > { %v646_v63 = vmul.f32 %v1795_v29, %v2657_v19  ;;  %v716_v45 = vadd.f32 %v715_v43, %v657_v1  ;;  %v2659_v1 = vmax.f32 %v1944_v44, 0.0  ;;  %v2660_v61 = vmax.f32 %v1960_v12, 0.0 }
 0x11f   : > { %v728_v28 = vadd.f32 %v727_v40, %v646_v63  ;;  %v717_v60 = vadd.f32 %v716_v45, %v661_v32  ;;  %v643_v43 = vmul.f32 %v1743_v27, %v2659_v1  ;;  %v704_v40 = vadd.f32 %v703_v20, %v1804_v26 }
 0x120   : > { %v371_v42 = vpop.f32.mrf.mxu0  ;;  %v419_v0 = vpop.f32.mrf.mxu1  ;;  %v662_v1 = vmul.f32 %v1872_v37, %v2660_v61  ;;  %v677_v20 = vmul.f32 %v1993_v59, %v2570_v15  ;;  %v2583_v61 = vmax.f32 %v2009_v31, 0.0  ;;  %v2662_v15 = vmax.f32 %v1892_v21, 0.0 }
 0x121   : > { %v729_v45 = vadd.f32 %v728_v28, %v1657_v4  ;;  %v718_v32 = vadd.f32 %v717_v60, %v1662_v30  ;;  %v2016_v27 = vadd.f32 %v1510_v50, %v371_v42  ;;  %v464_v63 = vpop.f32.mrf.mxu2  ;;  %v2025_v19 = vadd.f32 %v1510_v50, %v419_v0  ;;  %v512_v22 = vpop.f32.mrf.mxu3 }
 0x122   : > { %v2028_v4 = vadd.f32 %v1510_v50, %v464_v63  ;;  %v742_v28 = vadd.f32 %v741_v53, %v643_v43  ;;  %v545_v60 = vmax.f32 %v2005_v2, 0.0  ;;  %v2661_v0 = vmax.f32 %v1981_v36, 0.0 }
 0x123   : > { %v533_v26 = vmax.f32 %v2016_v27, 0.0  ;;  %v730_v30 = vadd.f32 %v729_v45, %v1833_v33  ;;  %v719_v42 = vadd.f32 %v718_v32, %v1845_v34  ;;  %v705_v62 = vadd.f32 %v704_v40, %v672_v35 }
 0x124   : > { %v676_v63 = vmul.f32 %v1993_v59, %v2661_v0  ;;  %v686_v34 = vmul.f32 %v1676_v10, %v2662_v15  ;;  %v2049_v53 = vadd.f32 %v1510_v50, %v1505_v49  ;;  %v549_v43 = vmax.f32 %v2025_v19, 0.0 }
 0x125   : > { %v647_v33 = vmul.f32 %v1795_v29, %v533_v26  ;;  %v731_v45 = vadd.f32 %v730_v30, %v658_v23  ;;  %v720_v46 = vadd.f32 %v719_v42, %v673_v16  ;;  %v2575_v32 = vmax.f32 %v2028_v4, 0.0 }
 0x126   : > { %v2663_v35 = vmax.f32 %v1904_v25, 0.0  ;;  %v2573_v30 = vmax.f32 %v1978_v7, 0.0  ;;  %v659_v15 = vmul.f32 %v1773_v17, %v545_v60  ;;  %v2571_v49 = vmax.f32 %v1991_v18, 0.0 }
 0x127   : > { %v743_v29 = vadd.f32 %v742_v28, %v647_v33  ;;  %v732_v23 = vadd.f32 %v731_v45, %v662_v1  ;;  %v721_v16 = vadd.f32 %v720_v46, %v677_v20  ;;  %v2063_v42 = vadd.f32 %v1510_v50, %v1711_v52 }
 0x128   : > { %v671_v40 = vmul.f32 %v1642_v8, %v2663_v35  ;;  %v674_v0 = vmul.f32 %v1827_v9, %v2583_v61  ;;  %v706_v8 = vadd.f32 %v705_v62, %v676_v63  ;;  %v2072_v28 = vadd.f32 %v1510_v50, %v1797_v3  ;;  %v2724_v61 = vld [vmem:[#allocation40_spill] sm:$0xff] }
 0x129   : > { %v744_v1 = vadd.f32 %v743_v29, %v1702_v11  ;;  %v733_v46 = vadd.f32 %v732_v23, %v1716_v24  ;;  %v467_v20 = vpop.f32.mrf.mxu2  ;;  %v663_v17 = vmul.f32 %v1872_v37, %v549_v43  ;;  %v678_v52 = vmul.f32 %v1993_v59, %v2575_v32 }
 0x12a   : > { %v2082_v62 = vadd.f32 %v1510_v50, %v1970_v5  ;;  %v722_v11 = vadd.f32 %v721_v16, %v1673_v6  ;;  %v2088_v3 = vadd.f32 %v1510_v50, %v467_v20  ;;  %v688_v37 = vmul.f32 %v1928_v14, %v2573_v30  ;;  %v2664_v6 = vld [vmem:[#allocation18_spill] sm:$0xff] }
 0x12b   : > { %v745_v24 = vadd.f32 %v744_v1, %v1921_v48  ;;  %v734_v63 = vadd.f32 %v733_v46, %v1934_v38  ;;  %v2572_v33 = vmax.f32 %v2063_v42, 0.0  ;;  %v2096_v45 = vadd.f32 %v1510_v50, %v1883_v56 }
 0x12c   : > { %v599_v5 = vrot.slane %v1531_v57, 7  ;;  %v707_v35 = vadd.f32 %v706_v8, %v2664_v6  ;;  %v2101_v38 = vadd.f32 %v1510_v50, %v512_v22  ;;  %v689_v23 = vmul.f32 %v1928_v14, %v2571_v49  ;;  %v515_v8 = vpop.f32.mrf.mxu3  ;;  %v2667_v6 = vld [vmem:[#allocation36_spill] sm:$0xff] }
 0x12d   : > { %v746_v48 = vadd.f32 %v745_v24, %v659_v15  ;;  %v735_v29 = vadd.f32 %v734_v63, %v674_v0  ;;  %v2582_v16 = vmax.f32 %v2072_v28, 0.0  ;;  %v2574_v1 = vmax.f32 %v2082_v62, 0.0  ;;  %v2666_v15 = vld [vmem:[#allocation34_spill] sm:$0xff] }
 0x12e   : > { %2665 = vst [vmem:[#allocation18_spill] sm:$0xff] %v2101_v38  ;;  %v723_v20 = vadd.f32 %v722_v11, %v1861_v41  ;;  %v2581_v57 = vmax.f32 %v2088_v3, 0.0  ;;  %v690_v22 = vmul.f32 %v1928_v14, %v2572_v33  ;;  %v2115_v0 = vadd.f32 %v1510_v50, %v2666_v15 }
 0x12f   : > { %v747_v46 = vadd.f32 %v746_v48, %v663_v17  ;;  %v736_v56 = vadd.f32 %v735_v29, %v678_v52  ;;  %v2577_v24 = vmax.f32 %v2096_v45, 0.0  ;;  %v615_v63 = vperm.slane %v599_v5, 0  ;;  %v2668_v17 = vld [vmem:[#allocation30_spill] sm:$0xff]  ;;  %v2669_v48 = vld [vmem:[#allocation27_spill] sm:$0xff] }
 0x130   : > { %v708_v49 = vadd.f32 %v707_v35, %v2667_v6  ;;  %v2576_v11 = vmax.f32 %v2101_v38, 0.0  ;;  %v675_v29 = vmul.f32 %v1827_v9, %v2582_v16  ;;  %v2128_v15 = vadd.f32 %v1510_v50, %v515_v8 }
 0x131   : > { %v748_v52 = vadd.f32 %v747_v46, %v2668_v17  ;;  %v737_v41 = vadd.f32 %v736_v56, %v2669_v48  ;;  %v693_v33 = vmul.f32 %v615_v63, %v2574_v1  ;;  %v1300_v30 = vmov 32.0   ;;  %v2671_v1 = vld [vmem:[#allocation23_spill] sm:$0xff] }
 0x132   : > { %2670 = vst [vmem:[#allocation34_spill] sm:$0xff] %v2128_v15  ;;  %1272 = vrcp.f32 %v1300_v30  ;;  %v724_v5 = vadd.f32 %v723_v20, %v689_v23  ;;  %v679_v35 = vmul.f32 %v1993_v59, %v2581_v57  ;;  %v2579_v6 = vmax.f32 %v2049_v53, 0.0  ;;  %v2673_v23 = vld [vmem:[#allocation11_spill] sm:$0xff] }
 0x133   : > { %v749_v46 = vadd.f32 %v748_v52, %v671_v40  ;;  %v738_v56 = vadd.f32 %v737_v41, %v686_v34  ;;  %v692_v9 = vmul.f32 %v615_v63, %v2577_v24  ;;  %v709_v17 = vadd.f32 %v708_v49, %v688_v37 }
 0x134   : > { %v694_v50 = vmul.f32 %v615_v63, %v2576_v11  ;;  %v2672_v30 = vmax.f32 %v2671_v1, 0.0  ;;  %v2578_v32 = vmax.f32 %v2115_v0, 0.0  ;;  %v2142_v59 = vadd.f32 %v724_v5, %v693_v33 }
 0x135   : > { %v750_v48 = vadd.f32 %v749_v46, %v675_v29  ;;  %v739_v8 = vadd.f32 %v738_v56, %v690_v22  ;;  %v2580_v40 = vmax.f32 %v2128_v15, 0.0  ;;  %v687_v49 = vmul.f32 %v1676_v10, %v2579_v6 }
 0x136   : > { %v683_v20 = vmul.f32 %v2673_v23, %v2672_v30  ;;  %v710_v37 = vadd.f32 %v709_v17, %v692_v9  ;;  %v691_v22 = vmul.f32 %v1928_v14, %v2578_v32  ;;  %v774_v46 = vmul.f32 %v2142_v59, %v2142_v59 }
 0x137   : > { %v751_v34 = vadd.f32 %v750_v48, %v679_v35  ;;  %v740_v29 = vadd.f32 %v739_v8, %v694_v50  ;;  %v695_v33 = vmul.f32 %v615_v63, %v2580_v40 }
 0x138   : > { %v1273_v52 = vpop.eup %1272  ;;  %v773_v56 = vmul.f32 %v710_v37, %v710_v37  ;;  %v756_v48 = vadd.f32 %v2142_v59, %v710_v37 }
 0x139   : > { %v752_v41 = vadd.f32 %v751_v34, %v683_v20  ;;  %v766_v35 = vmul.f32 32.0, %v1273_v52  ;;  %v775_v30 = vmul.f32 %v740_v29, %v740_v29  ;;  %vm770_vm0 = vweird.f32 %v1273_v52 }
 0x13a   : > { %v777_v9 = vadd.f32 %v774_v46, %v773_v56  ;;  %v757_v17 = vadd.f32 %v756_v48, %v740_v29 }
 0x13b   : > { %v753_v5 = vadd.f32 %v752_v41, %v687_v49  ;;  %v767_v8 = vsub.f32 1.0, %v766_v35 }
 0x13c   : > { %v778_v23 = vadd.f32 %v777_v9, %v775_v30 }
 0x13d   : > { %v754_v10 = vadd.f32 %v753_v5, %v691_v22  ;;  %v768_v24 = vmul.f32 %v1273_v52, %v767_v8 }
 0x13f   : > { %v755_v50 = vadd.f32 %v754_v10, %v695_v33  ;;  %v769_v41 = vadd.f32 %v1273_v52, %v768_v24 }
 0x141   : > { %v758_v20 = vadd.f32 %v757_v17, %v755_v50  ;;  %v776_v14 = vmul.f32 %v755_v50, %v755_v50  ;;  %v771_v46 = vsel %vm770_vm0, %v1273_v52, %v769_v41 }
 0x143   : > { %v759_v34 = vrot.slane %v758_v20, 4  ;;  %v779_v11 = vadd.f32 %v778_v23, %v776_v14 }
 0x145   : > { %v760_v32 = vadd.f32 %v759_v34, %v758_v20  ;;  %v780_v6 = vrot.slane %v779_v11, 4 }
 0x147   : > { %v761_v63 = vrot.slane %v760_v32, 2  ;;  %v781_v49 = vadd.f32 %v780_v6, %v779_v11 }
 0x149   : > { %v762_v40 = vadd.f32 %v761_v63, %v760_v32  ;;  %v782_v57 = vrot.slane %v781_v49, 2 }
 0x14b   : > { %v763_v16 = vrot.slane %v762_v40, 1  ;;  %v783_v22 = vadd.f32 %v782_v57, %v781_v49 }
 0x14d   : > { %v764_v5 = vadd.f32 %v763_v16, %v762_v40  ;;  %v784_v33 = vrot.slane %v783_v22, 1 }
 0x14f   : > { %v772_v35 = vmul.f32 %v771_v46, %v764_v5  ;;  %v785_v56 = vadd.f32 %v784_v33, %v783_v22 }
 0x151   : > { %v786_v48 = vmul.f32 %v785_v56, %v771_v46  ;;  %v787_v30 = vmul.f32 %v772_v35, %v772_v35  ;;  %v790_v57 = vsub.f32 %v710_v37, %v772_v35  ;;  %v791_v16 = vsub.f32 %v2142_v59, %v772_v35 }
 0x152   : > { %v792_v40 = vsub.f32 %v740_v29, %v772_v35  ;;  %v793_v52 = vsub.f32 %v755_v50, %v772_v35 }
 0x153   : > { %v788_v10 = vsub.f32 %v786_v48, %v787_v30 }
 0x155   : > { %v789_v9 = vmax.f32 %v788_v10, 0.0 }
 0x157   : > { %v794_v17 = vadd.f32 1e-05, %v789_v9 }
 0x159   : > { %1274 = vrsqrt.f32 %v794_v17  ;;  %vm801_vm2 = vweird.f32 %v794_v17 }
 0x15f   : > { %v1275_v8 = vpop.eup %1274 }
 0x160   : > { %v796_v23 = vmul.f32 %v1275_v8, %v794_v17  ;;  %vm802_vm1 = vweird.f32 %v1275_v8 }
 0x161   : > { %vm803_vm3 = vmor %vm801_vm2, %vm802_vm1 }
 0x162   : > { %v797_v11 = vmul.f32 %v1275_v8, %v796_v23 }
 0x164   : > { %v798_v24 = vmul.f32 0.5, %v797_v11 }
 0x166   : > { %v799_v32 = vsub.f32 1.5, %v798_v24 }
 0x168   : > { %v800_v6 = vmul.f32 %v1275_v8, %v799_v32 }
 0x16a   : > { %v804_v20 = vsel %vm803_vm3, %v1275_v8, %v800_v6 }
 0x16b   : > { %v805_v14 = vmul.f32 %v804_v20, %v790_v57  ;;  %v806_v34 = vmul.f32 %v804_v20, %v791_v16  ;;  %v807_v63 = vmul.f32 %v804_v20, %v792_v40  ;;  %v808_v49 = vmul.f32 %v804_v20, %v793_v52 }
 0x16d   : > { %v1206_v41 = vmul.f32 -1.442695, %v805_v14  ;;  %v1207_v22 = vmul.f32 -1.442695, %v806_v34  ;;  %v1208_v46 = vmul.f32 -1.442695, %v807_v63 }
 0x16e   : > { %v1209_v5 = vmul.f32 -1.442695, %v808_v49 }
 0x16f   : > { %1276 = vpow2.f32 %v1206_v41 }
 0x170   : > { %1278 = vpow2.f32 %v1207_v22 }
 0x171   : > { %1280 = vpow2.f32 %v1208_v46 }
 0x172   : > { %1282 = vpow2.f32 %v1209_v5 }
 0x175   : > { %v1277_v33 = vpop.eup %1276 }
 0x176   : > { %v1279_v37 = vpop.eup %1278  ;;  %v821_v56 = vadd.f32 1.0, %v1277_v33 }
 0x177   : > { %v1281_v59 = vpop.eup %1280  ;;  %v822_v29 = vadd.f32 1.0, %v1279_v37 }
 0x178   : > { %v1283_v50 = vpop.eup %1282  ;;  %v823_v35 = vadd.f32 1.0, %v1281_v59  ;;  %1284 = vrcp.f32 %v821_v56  ;;  %v834_v30 = vand.u32 2147483647, %v821_v56  ;;  %v836_v9 = vand.u32 2147483648, %v821_v56 }
 0x179   : > { %v2157_v48 = vadd.f32 1.0, %v1283_v50  ;;  %1286 = vrcp.f32 %v822_v29  ;;  %vm830_vm4 = vweird.f32 %v821_v56  ;;  %vm845_vm5 = vweird.f32 %v822_v29 }
 0x17a   : > { %1288 = vrcp.f32 %v823_v35  ;;  %v849_v24 = vand.u32 2147483647, %v822_v29  ;;  %vm2160_vm6 = vcmp.eq.f32.partialorder %v834_v30, 8.507059e+37  ;;  %v851_v57 = vand.u32 2147483648, %v822_v29 }
 0x17b   : > { %1290 = vrcp.f32 %v2157_v48  ;;  %v837_v52 = vor.u32 1.1754944e-38, %v836_v9  ;;  %vm860_vm7 = vweird.f32 %v823_v35  ;;  %v864_v14 = vand.u32 2147483647, %v823_v35 }
 0x17c   : > { %vm2165_vm10 = vcmp.eq.f32.partialorder %v849_v24, 8.507059e+37  ;;  %v866_v46 = vand.u32 2147483648, %v823_v35  ;;  %v852_v50 = vor.u32 1.1754944e-38, %v851_v57  ;;  %v879_v30 = vand.u32 2147483647, %v2157_v48 }
 0x17d   : > { %v881_v9 = vand.u32 2147483648, %v2157_v48  ;;  %vm875_vm0 = vweird.f32 %v2157_v48  ;;  %vm865_vm1 = vcmp.eq.f32.partialorder %v864_v14, 8.507059e+37 }
 0x17e   : > { %v1285_v10 = vpop.eup %1284  ;;  %vm880_vm3 = vcmp.eq.f32.partialorder %v879_v30, 8.507059e+37 }
 0x17f   : > { %v1287_v17 = vpop.eup %1286  ;;  %v826_v8 = vmul.f32 %v1285_v10, %v821_v56  ;;  %vm831_vm8 = vweird.f32 %v1285_v10  ;;  %v886_v56 = vld [vmem:[%s2520_s4 + $0x8] sm:$0xff]  ;;  %v882_v6 = vor.u32 1.1754944e-38, %v881_v9 }
 0x180   : > { %v1289_v23 = vpop.eup %1288  ;;  %v841_v11 = vmul.f32 %v1287_v17, %v822_v29  ;;  %vm846_vm9 = vweird.f32 %v1287_v17  ;;  %vm832_vm12 = vmor %vm830_vm4, %vm831_vm8  ;;  %v867_v29 = vor.u32 1.1754944e-38, %v866_v46  ;;  %vm1117_vm4 = vcmask 1041409  }
 0x181   : > { %v827_v32 = vsub.f32 1.0, %v826_v8  ;;  %v856_v16 = vmul.f32 %v1289_v23, %v823_v35  ;;  %v1291_v40 = vpop.eup %1290  ;;  %vm861_vm11 = vweird.f32 %v1289_v23  ;;  %vm847_vm13 = vmor %vm845_vm5, %vm846_vm9  ;;  %v888_v35 = vld [vmem:[%s2520_s4 + $0x18] sm:$0xff]  ;;  %vm1119_vm5 = vcmask 1042434  }
 0x182   : > { %v842_v20 = vsub.f32 1.0, %v841_v11  ;;  %v871_v49 = vmul.f32 %v1291_v40, %v2157_v48  ;;  %vm876_vm14 = vweird.f32 %v1291_v40  ;;  %vm862_vm15 = vmor %vm860_vm7, %vm861_vm11  ;;  %vm1123_vm7 = vcmask 1044484  }
 0x183   : > { %v828_v34 = vmul.f32 %v1285_v10, %v827_v32  ;;  %v857_v63 = vsub.f32 1.0, %v856_v16  ;;  %v885_v32 = vld [vmem:[%s2520_s4] sm:$0xff]  ;;  %vm877_vm2 = vmor %vm875_vm0, %vm876_vm14  ;;  %vm1125_vm8 = vcmask 1045509   ;;  %vm1127_vm9 = vcmask 1046534  }
 0x184   : > { %v843_v41 = vmul.f32 %v1287_v17, %v842_v20  ;;  %v872_v37 = vsub.f32 1.0, %v871_v49 }
 0x185   : > { %v829_v5 = vadd.f32 %v1285_v10, %v828_v34  ;;  %v858_v33 = vmul.f32 %v1289_v23, %v857_v63 }
 0x186   : > { %v844_v59 = vadd.f32 %v1287_v17, %v843_v41  ;;  %v873_v24 = vmul.f32 %v1291_v40, %v872_v37 }
 0x187   : > { %v833_v8 = vsel %vm832_vm12, %v1285_v10, %v829_v5  ;;  %v859_v11 = vadd.f32 %v1289_v23, %v858_v33  ;;  %v887_v10 = vld [vmem:[%s2520_s4 + $0x10] sm:$0xff] }
 0x188   : > { %v838_v57 = vsel %vm2160_vm6, %v837_v52, %v833_v8  ;;  %v848_v16 = vsel %vm847_vm13, %v1287_v17, %v844_v59  ;;  %v874_v63 = vadd.f32 %v1291_v40, %v873_v24  ;;  %v2680_v33 = vld [vmem:[#allocation4_spill] sm:$0xff]  ;;  %v2686_v24 = vld [vmem:[#allocation21_spill] sm:$0xff]  ;;  %vm1121_vm6 = vcmask 1043459  }
 0x189   : > { %v853_v20 = vsel %vm2165_vm10, %v852_v50, %v848_v16  ;;  %v863_v34 = vsel %vm862_vm15, %v1289_v23, %v859_v11  ;;  %v2192_v17 = vmul.f32 %v885_v32, %v838_v57  ;;  %v2678_v23 = vld [vmem:[#allocation2_spill] sm:$0xff]  ;;  %v2681_v37 = vmax.f32 %v2680_v33, 0.0  ;;  %v2682_v50 = vld [vmem:[#allocation16_spill] sm:$0xff] }
 0x18a   : > { %v868_v49 = vsel %vm865_vm1, %v867_v29, %v863_v34  ;;  %v2194_v48 = vmul.f32 %v886_v56, %v853_v20  ;;  %v878_v52 = vsel %vm877_vm2, %v1291_v40, %v874_v63  ;;  %v2679_v14 = vmax.f32 %v2678_v23, 0.0  ;;  %v2684_v11 = vld [vmem:[#allocation8_spill] sm:$0xff] }
 0x18b   : > { %v2196_v41 = vmul.f32 %v887_v10, %v868_v49  ;;  %v883_v22 = vsel %vm880_vm3, %v882_v6, %v878_v52  ;;  %v2683_v9 = vmax.f32 %v2682_v50, 0.0  ;;  %v2685_v40 = vmax.f32 %v2684_v11, 0.0  ;;  %v2688_v57 = vld [vmem:[#allocation28_spill] sm:$0xff]  ;;  %v2694_v52 = vld [vmem:[#allocation33_spill] sm:$0xff]  ;;  %v2699_v11 = vld [vmem:[#allocation35_spill] sm:$0xff] }
 0x18c   : > { %v2198_v46 = vmul.f32 %v888_v35, %v883_v22  ;;  %v893_v5 = vmul.f32 %v2192_v17, %v2679_v14  ;;  %v894_v59 = vmul.f32 %v2194_v48, %v2681_v37  ;;  %v2687_v32 = vmax.f32 %v2686_v24, 0.0  ;;  %v2690_v10 = vld [vmem:[#allocation24_spill] sm:$0xff]  ;;  %v2697_v37 = vld [vmem:[#allocation13_spill] sm:$0xff] }
 0x18d   : > { %v897_v8 = vmul.f32 %v2192_v17, %v2683_v9  ;;  %v895_v30 = vmul.f32 %v2196_v41, %v2685_v40  ;;  %v2689_v16 = vmax.f32 %v2688_v57, 0.0  ;;  %v2691_v20 = vmax.f32 %v2690_v10, 0.0 }
 0x18e   : > { %v898_v56 = vmul.f32 %v2194_v48, %v2687_v32  ;;  %v2692_v63 = vmax.f32 %v1785_v13, 0.0  ;;  %v2693_v6 = vmax.f32 %v1876_v39, 0.0  ;;  %v2695_v22 = vmax.f32 %v2694_v52, 0.0 }
 0x18f   : > { %v899_v29 = vmul.f32 %v2196_v41, %v2689_v16  ;;  %v901_v34 = vmul.f32 %v2192_v17, %v2691_v20  ;;  %v2696_v14 = vmax.f32 %v1880_v47, 0.0  ;;  %v2698_v50 = vmax.f32 %v2697_v37, 0.0  ;;  %v2703_v16 = vld [vmem:[#allocation3_spill] sm:$0xff]  ;;  %v2709_v37 = vld [vmem:[#allocation14_spill] sm:$0xff] }
 0x190   : > { %v902_v49 = vmul.f32 %v2194_v48, %v2692_v63  ;;  %v903_v35 = vmul.f32 %v2196_v41, %v2693_v6  ;;  %v905_v23 = vmul.f32 %v2192_v17, %v2695_v22  ;;  %v2700_v13 = vmax.f32 %v2699_v11, 0.0  ;;  %v2705_v63 = vld [vmem:[#allocation5_spill] sm:$0xff]  ;;  %v2711_v11 = vld [vmem:[#allocation19_spill] sm:$0xff] }
 0x191   : > { %v906_v33 = vmul.f32 %v2194_v48, %v2696_v14  ;;  %v896_v9 = vmul.f32 %v2198_v46, %v2698_v50  ;;  %v2701_v39 = vmax.f32 %v1944_v44, 0.0  ;;  %v2702_v32 = vmax.f32 %v1951_v54, 0.0  ;;  %v2707_v22 = vld [vmem:[#allocation9_spill] sm:$0xff] }
 0x192   : > { %v900_v40 = vmul.f32 %v2198_v46, %v2700_v13  ;;  %v908_v47 = vmul.f32 %v2198_v46, %v533_v26  ;;  %v2704_v10 = vmax.f32 %v2703_v16, 0.0  ;;  %v2706_v6 = vmax.f32 %v2705_v63, 0.0  ;;  %v2713_v13 = vld [vmem:[#allocation22_spill] sm:$0xff]  ;;  %v2715_v16 = vld [vmem:[#allocation29_spill] sm:$0xff] }
 0x193   : > { %v904_v24 = vmul.f32 %v2198_v46, %v2701_v39  ;;  %v907_v57 = vmul.f32 %v2196_v41, %v2702_v32  ;;  %v2708_v44 = vmax.f32 %v2707_v22, 0.0  ;;  %v2710_v54 = vmax.f32 %v2709_v37, 0.0 }
 0x194   : > { %v909_v20 = vmul.f32 %v2192_v17, %v2704_v10  ;;  %v910_v52 = vmul.f32 %v2194_v48, %v2706_v6  ;;  %v2712_v27 = vmax.f32 %v2711_v11, 0.0  ;;  %v2714_v39 = vmax.f32 %v2713_v13, 0.0 }
 0x195   : > { %v911_v14 = vmul.f32 %v2196_v41, %v2708_v44  ;;  %v912_v50 = vmul.f32 %v2198_v46, %v2710_v54  ;;  %v2716_v10 = vmax.f32 %v2715_v16, 0.0  ;;  %v2717_v6 = vmax.f32 %v1849_v51, 0.0  ;;  %v2719_v54 = vld [vmem:[#allocation39_spill] sm:$0xff] }
 0x196   : > { %v913_v26 = vmul.f32 %v2192_v17, %v2712_v27  ;;  %v914_v32 = vmul.f32 %v2194_v48, %v2714_v39  ;;  %v2718_v44 = vmax.f32 %v1822_v55, 0.0  ;;  %v2720_v11 = vmax.f32 %v2719_v54, 0.0 }
 0x197   : > { %v915_v63 = vmul.f32 %v2196_v41, %v2716_v10  ;;  %v916_v22 = vmul.f32 %v2198_v46, %v2717_v6  ;;  %v2721_v13 = vmax.f32 %v1926_v58, 0.0  ;;  %v920_v16 = vmul.f32 %v2198_v46, %v545_v60  ;;  %v2722_v10 = vld [vmem:[#allocation37_spill] sm:$0xff] }
 0x198   : > { %v917_v37 = vmul.f32 %v2192_v17, %v2718_v44  ;;  %v918_v27 = vmul.f32 %v2194_v48, %v2720_v11  ;;  %v2723_v51 = vmax.f32 %v2722_v10, 0.0  ;;  %v2725_v55 = vmax.f32 %v2724_v61, 0.0  ;;  %v2730_v10 = vld [vmem:[#allocation10_spill] sm:$0xff]  ;;  %v2733_v61 = vld [vmem:[#allocation15_spill] sm:$0xff] }
 0x199   : > { %v919_v39 = vmul.f32 %v2196_v41, %v2721_v13  ;;  %v2726_v54 = vmax.f32 %v1960_v12, 0.0  ;;  %v924_v58 = vmul.f32 %v2198_v46, %v549_v43  ;;  %v2727_v13 = vld [vmem:[#allocation6_spill] sm:$0xff]  ;;  %v2731_v15 = vmax.f32 %v2730_v10, 0.0  ;;  %v2739_v43 = vld [vmem:[#allocation25_spill] sm:$0xff] }
 0x19a   : > { %v921_v6 = vmul.f32 %v2192_v17, %v2723_v51  ;;  %v922_v44 = vmul.f32 %v2194_v48, %v2725_v55  ;;  %v2728_v2 = vmax.f32 %v2727_v13, 0.0  ;;  %v2734_v55 = vmax.f32 %v2733_v61, 0.0 }
 0x19b   : > { %v923_v11 = vmul.f32 %v2196_v41, %v2726_v54  ;;  %v2304_v51 = vmul.f32 %v2194_v48, %v2731_v15  ;;  %v2736_v54 = vld [vmem:[#allocation20_spill] sm:$0xff]  ;;  %v2740_v13 = vmax.f32 %v2739_v43, 0.0  ;;  %vm1129_vm10 = vcmask 1047559  }
 0x19c   : > { %v2299_v60 = vmul.f32 %v2192_v17, %v2728_v2  ;;  %v2309_v12 = vmul.f32 %v2196_v41, %v2734_v55  ;;  %v2737_v38 = vmax.f32 %v2736_v54, 0.0  ;;  %v2747_v54 = vmax.f32 %v1904_v25, 0.0 }
 0x19d   : > { %2732 = vst [vmem:[#allocation30_spill] sm:$0xff] %v2304_v51  ;;  %v2319_v2 = vmul.f32 %v2192_v17, %v2740_v13  ;;  %v2744_v51 = vld [vmem:[#allocation38_spill] sm:$0xff]  ;;  %v2757_v25 = vmax.f32 %v2072_v28, 0.0  ;;  %v2766_v28 = vmax.f32 %v2088_v3, 0.0  ;;  %v2777_v3 = vmax.f32 %v2671_v1, 0.0 }
 0x19e   : > { %2729 = vst [vmem:[#allocation36_spill] sm:$0xff] %v2299_v60  ;;  %v2314_v19 = vmul.f32 %v2198_v46, %v2737_v38  ;;  %v2741_v60 = vld [vmem:[#allocation31_spill] sm:$0xff]  ;;  %v2745_v61 = vmax.f32 %v2744_v51, 0.0  ;;  %v2334_v38 = vmul.f32 %v2198_v46, %v2747_v54  ;;  %v2755_v51 = vmax.f32 %v2009_v31, 0.0 }
 0x19f   : > { %2735 = vst [vmem:[#allocation27_spill] sm:$0xff] %v2309_v12  ;;  %v2742_v10 = vmax.f32 %v2741_v60, 0.0  ;;  %v2752_v12 = vld [vmem:[#allocation42_spill] sm:$0xff]  ;;  %v2354_v54 = vmul.f32 %v2198_v46, %v2757_v25  ;;  %v2764_v31 = vmax.f32 %v2028_v4, 0.0  ;;  %v2374_v25 = vmul.f32 %v2198_v46, %v2766_v28 }
 0x1a0   : > { %2738 = vst [vmem:[#allocation23_spill] sm:$0xff] %v2314_v19  ;;  %v2329_v55 = vmul.f32 %v2196_v41, %v2745_v61  ;;  %v2749_v19 = vld [vmem:[#allocation41_spill] sm:$0xff]  ;;  %v2753_v60 = vmax.f32 %v2752_v12, 0.0  ;;  %v2349_v61 = vmul.f32 %v2196_v41, %v2755_v51  ;;  %v2394_v28 = vmul.f32 %v2198_v46, %v2777_v3 }
 0x1a1   : > { %v2324_v15 = vmul.f32 %v2194_v48, %v2742_v10  ;;  %2748 = vst [vmem:[#allocation4_spill] sm:$0xff] %v2334_v38  ;;  %v2750_v43 = vmax.f32 %v2749_v19, 0.0  ;;  %v2759_v19 = vmax.f32 %v1981_v36, 0.0  ;;  %v2761_v38 = vld [vmem:[#allocation43_spill] sm:$0xff]  ;;  %v2369_v51 = vmul.f32 %v2196_v41, %v2764_v31 }
 0x1a2   : > { %2746 = vst [vmem:[#allocation2_spill] sm:$0xff] %v2329_v55  ;;  %v2344_v10 = vmul.f32 %v2194_v48, %v2753_v60  ;;  %v2762_v12 = vmax.f32 %v2761_v38, 0.0  ;;  %v2774_v55 = vld [vmem:[#allocation17_spill] sm:$0xff]  ;;  %v966_v1 = vadd.f32 %v898_v56, %v897_v8  ;;  %v984_v3 = vadd.f32 %v906_v33, %v905_v23 }
 0x1a3   : > { %2743 = vst [vmem:[#allocation11_spill] sm:$0xff] %v2324_v15  ;;  %v2339_v13 = vmul.f32 %v2192_v17, %v2750_v43  ;;  %v2359_v43 = vmul.f32 %v2192_v17, %v2759_v19  ;;  %v2775_v4 = vmax.f32 %v2774_v55, 0.0  ;;  %v2785_v55 = vmax.f32 %v1892_v21, 0.0 }
 0x1a4   : > { %2754 = vst [vmem:[#allocation8_spill] sm:$0xff] %v2344_v10  ;;  %v2364_v60 = vmul.f32 %v2194_v48, %v2762_v12 }
 0x1a5   : > { %2751 = vst [vmem:[#allocation16_spill] sm:$0xff] %v2339_v13  ;;  %v2389_v31 = vmul.f32 %v2196_v41, %v2775_v4  ;;  %v2409_v4 = vmul.f32 %v2196_v41, %v2785_v55 }
 0x1a6   : > { %2756 = vst [vmem:[#allocation21_spill] sm:$0xff] %v2349_v61  ;;  %v2771_v61 = vld [vmem:[#allocation12_spill] sm:$0xff] }
 0x1a7   : > { %2758 = vst [vmem:[#allocation28_spill] sm:$0xff] %v2354_v54  ;;  %v2768_v54 = vld [vmem:[#allocation7_spill] sm:$0xff]  ;;  %v2772_v38 = vmax.f32 %v2771_v61, 0.0 }
 0x1a8   : > { %2760 = vst [vmem:[#allocation24_spill] sm:$0xff] %v2359_v43  ;;  %v2769_v36 = vmax.f32 %v2768_v54, 0.0 }
 0x1a9   : > { %2763 = vst [vmem:[#allocation33_spill] sm:$0xff] %v2364_v60  ;;  %v2384_v12 = vmul.f32 %v2194_v48, %v2772_v38  ;;  %v1020_v60 = vadd.f32 %v922_v44, %v921_v6 }
 0x1aa   : > { %2765 = vst [vmem:[#allocation13_spill] sm:$0xff] %v2369_v51  ;;  %v2379_v19 = vmul.f32 %v2192_v17, %v2769_v36  ;;  %v2782_v51 = vld [vmem:[#allocation32_spill] sm:$0xff] }
 0x1ab   : > { %2767 = vst [vmem:[#allocation35_spill] sm:$0xff] %v2374_v25  ;;  %v2779_v25 = vld [vmem:[#allocation26_spill] sm:$0xff]  ;;  %v2783_v61 = vmax.f32 %v2782_v51, 0.0  ;;  %v985_v51 = vadd.f32 %v984_v3, %v907_v57  ;;  %v1021_v13 = vadd.f32 %v1020_v60, %v923_v11 }
 0x1ac   : > { %2770 = vst [vmem:[#allocation3_spill] sm:$0xff] %v2379_v19  ;;  %v2780_v54 = vmax.f32 %v2779_v25, 0.0  ;;  %v1002_v19 = vadd.f32 %v914_v32, %v913_v26  ;;  %v1011_v25 = vadd.f32 %v918_v27, %v917_v37  ;;  %v2787_v37 = vmax.f32 %v2049_v53, 0.0 }
 0x1ad   : > { %2773 = vst [vmem:[#allocation5_spill] sm:$0xff] %v2384_v12  ;;  %v2404_v38 = vmul.f32 %v2194_v48, %v2783_v61  ;;  %v975_v12 = vadd.f32 %v902_v49, %v901_v34  ;;  %v1022_v56 = vadd.f32 %v1021_v13, %v924_v58  ;;  %v2788_v53 = vmax.f32 %v1978_v7, 0.0 }
 0x1ae   : > { %2776 = vst [vmem:[#allocation9_spill] sm:$0xff] %v2389_v31  ;;  %v2399_v36 = vmul.f32 %v2192_v17, %v2780_v54  ;;  %v957_v31 = vadd.f32 %v894_v59, %v893_v5  ;;  %v1003_v61 = vadd.f32 %v1002_v19, %v915_v63  ;;  %v948_v27 = vmul.f32 %v2198_v46, %v2787_v37 }
 0x1af   : > { %2778 = vst [vmem:[#allocation14_spill] sm:$0xff] %v2394_v28  ;;  %v993_v28 = vadd.f32 %v910_v52, %v909_v20  ;;  %v976_v43 = vadd.f32 %v975_v12, %v903_v35  ;;  %v1023_v57 = vrot.slane %v1022_v56, 4  ;;  %v949_v19 = vmul.f32 %v2192_v17, %v2788_v53 }
 0x1b0   : > { %2781 = vst [vmem:[#allocation19_spill] sm:$0xff] %v2399_v36  ;;  %v958_v54 = vadd.f32 %v957_v31, %v895_v30  ;;  %v967_v36 = vadd.f32 %v966_v1, %v899_v29  ;;  %v1004_v59 = vadd.f32 %v1003_v61, %v916_v22  ;;  %v2789_v12 = vmax.f32 %v1991_v18, 0.0  ;;  %v2796_v61 = vld [vmem:[#allocation34_spill] sm:$0xff] }
 0x1b1   : > { %2784 = vst [vmem:[#allocation22_spill] sm:$0xff] %v2404_v38  ;;  %v994_v10 = vadd.f32 %v993_v28, %v911_v14  ;;  %v1012_v38 = vadd.f32 %v1011_v25, %v919_v39  ;;  %v977_v55 = vadd.f32 %v976_v43, %v904_v24  ;;  %v2790_v28 = vmax.f32 %v2063_v42, 0.0  ;;  %v2812_v37 = vld [vmem:[#allocation13_spill] sm:$0xff] }
 0x1b2   : > { %2786 = vst [vmem:[#allocation29_spill] sm:$0xff] %v2409_v4  ;;  %v959_v21 = vadd.f32 %v958_v54, %v896_v9  ;;  %v968_v15 = vadd.f32 %v967_v36, %v900_v40  ;;  %v986_v4 = vadd.f32 %v985_v51, %v908_v47  ;;  %v1005_v29 = vrot.slane %v1004_v59, 4  ;;  %v2794_v54 = vld [vmem:[#allocation18_spill] sm:$0xff] }
 0x1b3   : > { %v995_v5 = vadd.f32 %v994_v10, %v912_v50  ;;  %v1013_v8 = vadd.f32 %v1012_v38, %v920_v16  ;;  %v978_v23 = vrot.slane %v977_v55, 4  ;;  %v1024_v47 = vadd.f32 %v1023_v57, %v1022_v56  ;;  %v2805_v57 = vld [vmem:[#allocation3_spill] sm:$0xff] }
 0x1b4   : > { %v960_v34 = vrot.slane %v959_v21, 4  ;;  %v969_v49 = vrot.slane %v968_v15, 4  ;;  %v987_v33 = vrot.slane %v986_v4, 4  ;;  %v1006_v40 = vadd.f32 %v1005_v29, %v1004_v59  ;;  %v2798_v59 = vld [vmem:[#allocation36_spill] sm:$0xff]  ;;  %v2804_v29 = vld [vmem:[#allocation33_spill] sm:$0xff] }
 0x1b5   : > { %v996_v30 = vrot.slane %v995_v5, 4  ;;  %v1014_v35 = vrot.slane %v1013_v8, 4  ;;  %v979_v14 = vadd.f32 %v978_v23, %v977_v55  ;;  %v950_v31 = vmul.f32 %v2194_v48, %v2789_v12  ;;  %v2802_v23 = vld [vmem:[#allocation8_spill] sm:$0xff] }
 0x1b6   : > { %v961_v20 = vadd.f32 %v960_v34, %v959_v21  ;;  %v970_v52 = vadd.f32 %v969_v49, %v968_v15  ;;  %v988_v26 = vadd.f32 %v987_v33, %v986_v4  ;;  %v1007_v16 = vrot.slane %v1006_v40, 2  ;;  %v2801_v49 = vld [vmem:[#allocation16_spill] sm:$0xff] }
 0x1b7   : > { %v997_v9 = vadd.f32 %v996_v30, %v995_v5  ;;  %v1015_v24 = vadd.f32 %v1014_v35, %v1013_v8  ;;  %v980_v63 = vrot.slane %v979_v14, 2  ;;  %v1025_v15 = vrot.slane %v1024_v47, 2  ;;  %v2799_v8 = vld [vmem:[#allocation30_spill] sm:$0xff]  ;;  %v2803_v30 = vld [vmem:[#allocation24_spill] sm:$0xff] }
 0x1b8   : > { %v962_v50 = vrot.slane %v961_v20, 2  ;;  %v971_v32 = vrot.slane %v970_v52, 2  ;;  %v989_v22 = vrot.slane %v988_v26, 2  ;;  %v2424_v43 = vadd.f32 %v1007_v16, %v1006_v40  ;;  %v2813_v16 = vld [vmem:[#allocation9_spill] sm:$0xff] }
 0x1b9   : > { %v998_v39 = vrot.slane %v997_v9, 2  ;;  %v1016_v6 = vrot.slane %v1015_v24, 2  ;;  %v2418_v58 = vadd.f32 %v980_v63, %v979_v14  ;;  %v951_v36 = vmul.f32 %v2196_v41, %v2790_v28  ;;  %v2807_v14 = vld [vmem:[#allocation19_spill] sm:$0xff] }
 0x1ba   : > { %v2414_v44 = vadd.f32 %v962_v50, %v961_v20  ;;  %v2416_v11 = vadd.f32 %v971_v32, %v970_v52  ;;  %v2420_v13 = vadd.f32 %v989_v22, %v988_v26  ;;  %v2791_v38 = vmax.f32 %v2115_v0, 0.0  ;;  %v2806_v20 = vld [vmem:[#allocation5_spill] sm:$0xff]  ;;  %v2808_v26 = vld [vmem:[#allocation22_spill] sm:$0xff] }
 0x1bb   : > { %v2422_v10 = vadd.f32 %v998_v39, %v997_v9  ;;  %v2426_v60 = vadd.f32 %v1016_v6, %v1015_v24  ;;  %v2792_v1 = vmax.f32 %v2096_v45, 0.0  ;;  %v2793_v7 = vmax.f32 %v2082_v62, 0.0  ;;  %v2810_v32 = vld [vmem:[#allocation2_spill] sm:$0xff]  ;;  %v2811_v22 = vld [vmem:[#allocation21_spill] sm:$0xff] }
 0x1bc   : > { %v952_v4 = vmul.f32 %v2198_v46, %v2791_v38  ;;  %v2795_v18 = vmax.f32 %v2794_v54, 0.0  ;;  %v2797_v42 = vmax.f32 %v2796_v61, 0.0  ;;  %v964_v0 = vrot.slane %v2414_v44, 1  ;;  %v2815_v38 = vld [vmem:[#allocation23_spill] sm:$0xff] }
 0x1bd   : > { %v953_v3 = vmul.f32 %v2192_v17, %v2792_v1  ;;  %v954_v25 = vmul.f32 %v2194_v48, %v2793_v7  ;;  %v973_v55 = vrot.slane %v2416_v11, 1  ;;  %v982_v45 = vrot.slane %v2418_v58, 1  ;;  %v2816_v7 = vld [vmem:[#allocation4_spill] sm:$0xff] }
 0x1be   : > { %v955_v51 = vmul.f32 %v2196_v41, %v2795_v18  ;;  %v956_v21 = vmul.f32 %v2198_v46, %v2797_v42  ;;  %v2455_v5 = vadd.f32 %v1025_v15, %v1024_v47  ;;  %v991_v62 = vrot.slane %v2420_v13, 1  ;;  %v2800_v46 = vld [vmem:[#allocation11_spill] sm:$0xff]  ;;  %v2814_v15 = vld [vmem:[#allocation29_spill] sm:$0xff]  ;;  %v2819_v18 = vld [vmem:[#allocation14_spill] sm:$0xff] }
 0x1bf   : > { %v1000_v17 = vrot.slane %v2422_v10, 1  ;;  %v1009_v48 = vrot.slane %v2424_v43, 1  ;;  %v1018_v41 = vrot.slane %v2426_v60, 1  ;;  %v1029_v56 = vadd.f32 %v2799_v8, %v2798_v59  ;;  %v2809_v47 = vld [vmem:[#allocation27_spill] sm:$0xff] }
 0x1c0   : > { %v1038_v34 = vadd.f32 %v2800_v46, %v2319_v2  ;;  %v1047_v33 = vadd.f32 %v2802_v23, %v2801_v49  ;;  %v1056_v35 = vadd.f32 %v2804_v29, %v2803_v30  ;;  %v1065_v52 = vadd.f32 %v2806_v20, %v2805_v57 }
 0x1c1   : > { %v1074_v9 = vadd.f32 %v2808_v26, %v2807_v14  ;;  %v1083_v40 = vadd.f32 %v950_v31, %v949_v19  ;;  %v1092_v24 = vadd.f32 %v954_v25, %v953_v3  ;;  %v1030_v50 = vadd.f32 %v1029_v56, %v2809_v47  ;;  %v2817_v19 = vld [vmem:[#allocation28_spill] sm:$0xff]  ;;  %v2818_v3 = vld [vmem:[#allocation35_spill] sm:$0xff] }
 0x1c2   : > { %v1039_v63 = vadd.f32 %v1038_v34, %v2810_v32  ;;  %v1048_v2 = vadd.f32 %v1047_v33, %v2811_v22  ;;  %v1057_v39 = vadd.f32 %v1056_v35, %v2812_v37  ;;  %v1066_v6 = vadd.f32 %v1065_v52, %v2813_v16 }
 0x1c3   : > { %v1075_v53 = vadd.f32 %v1074_v9, %v2814_v15  ;;  %v1084_v12 = vadd.f32 %v1083_v40, %v951_v36  ;;  %v1093_v28 = vadd.f32 %v1092_v24, %v955_v51  ;;  %v1031_v1 = vadd.f32 %v1030_v50, %v2815_v38 }
 0x1c4   : > { %v1040_v54 = vadd.f32 %v1039_v63, %v2816_v7  ;;  %v1049_v31 = vadd.f32 %v1048_v2, %v2817_v19  ;;  %v1058_v25 = vadd.f32 %v1057_v39, %v2818_v3  ;;  %v1067_v61 = vadd.f32 %v1066_v6, %v2819_v18 }
 0x1c5   : > { %v1076_v42 = vadd.f32 %v1075_v53, %v948_v27  ;;  %v1085_v59 = vadd.f32 %v1084_v12, %v952_v4  ;;  %v1094_v8 = vadd.f32 %v1093_v28, %v956_v21  ;;  %v1032_v56 = vrot.slane %v1031_v1, 4 }
 0x1c6   : > { %v1041_v46 = vrot.slane %v1040_v54, 4  ;;  %v1050_v34 = vrot.slane %v1049_v31, 4  ;;  %v1059_v49 = vrot.slane %v1058_v25, 4  ;;  %v1068_v23 = vrot.slane %v1067_v61, 4 }
 0x1c7   : > { %v1077_v36 = vrot.slane %v1076_v42, 4  ;;  %v1086_v51 = vrot.slane %v1085_v59, 4  ;;  %v1095_v33 = vrot.slane %v1094_v8, 4  ;;  %v1033_v30 = vadd.f32 %v1032_v56, %v1031_v1 }
 0x1c8   : > { %v1042_v29 = vadd.f32 %v1041_v46, %v1040_v54  ;;  %v1051_v35 = vadd.f32 %v1050_v34, %v1049_v31  ;;  %v1060_v57 = vadd.f32 %v1059_v49, %v1058_v25  ;;  %v1069_v20 = vadd.f32 %v1068_v23, %v1067_v61 }
 0x1c9   : > { %v1078_v52 = vadd.f32 %v1077_v36, %v1076_v42  ;;  %v1087_v14 = vadd.f32 %v1086_v51, %v1085_v59  ;;  %v1096_v26 = vadd.f32 %v1095_v33, %v1094_v8  ;;  %v1034_v9 = vrot.slane %v1033_v30, 2 }
 0x1ca   : > { %v1043_v27 = vrot.slane %v1042_v29, 2  ;;  %v1052_v4 = vrot.slane %v1051_v35, 2  ;;  %v1061_v21 = vrot.slane %v1060_v57, 2  ;;  %v1070_v40 = vrot.slane %v1069_v20, 2 }
 0x1cb   : > { %v1079_v24 = vrot.slane %v1078_v52, 2  ;;  %v1088_v47 = vrot.slane %v1087_v14, 2  ;;  %v1097_v50 = vrot.slane %v1096_v26, 2  ;;  %v1035_v32 = vadd.f32 %v1034_v9, %v1033_v30 }
 0x1cc   : > { %v1044_v63 = vadd.f32 %v1043_v27, %v1042_v29  ;;  %v1053_v22 = vadd.f32 %v1052_v4, %v1051_v35  ;;  %v1062_v2 = vadd.f32 %v1061_v21, %v1060_v57  ;;  %v965_v37 = vadd.f32 %v964_v0, %v2414_v44 }
 0x1cd   : > { %v974_v39 = vadd.f32 %v973_v55, %v2416_v11  ;;  %v1027_v16 = vrot.slane %v2455_v5, 1  ;;  %v1071_v6 = vadd.f32 %v1070_v40, %v1069_v20  ;;  %v1036_v15 = vrot.slane %v1035_v32, 1 }
 0x1ce   : > { %v1045_v53 = vrot.slane %v1044_v63, 1  ;;  %v1054_v12 = vrot.slane %v1053_v22, 1  ;;  %v1080_v28 = vadd.f32 %v1079_v24, %v1078_v52  ;;  %v983_v38 = vadd.f32 %v982_v45, %v2418_v58 }
 0x1cf   : > { %v992_v1 = vadd.f32 %v991_v62, %v2420_v13  ;;  %v1089_v7 = vadd.f32 %v1088_v47, %v1087_v14  ;;  %v1098_v54 = vadd.f32 %v1097_v50, %v1096_v26  ;;  %v1001_v44 = vadd.f32 %v1000_v17, %v2422_v10 }
 0x1d0   : > { %v1037_v11 = vadd.f32 %v1036_v15, %v1035_v32  ;;  %v1046_v0 = vadd.f32 %v1045_v53, %v1044_v63  ;;  %v1063_v55 = vrot.slane %v1062_v2, 1  ;;  %v1010_v19 = vadd.f32 %v1009_v48, %v2424_v43 }
 0x1d1   : > { %v1019_v58 = vadd.f32 %v1018_v41, %v2426_v60  ;;  %v1055_v45 = vadd.f32 %v1054_v12, %v1053_v22  ;;  %v1072_v13 = vrot.slane %v1071_v6, 1  ;;  %v1081_v62 = vrot.slane %v1080_v28, 1 }
 0x1d2   : > { %v1090_v31 = vrot.slane %v1089_v7, 1  ;;  %v1099_v10 = vrot.slane %v1098_v54, 1  ;;  %v1118_v17 = vsel %vm1117_vm4, %v974_v39, %v965_v37  ;;  %v1064_v3 = vadd.f32 %v1063_v55, %v1062_v2 }
 0x1d3   : > { %v1120_v25 = vsel %vm1119_vm5, %v983_v38, %v1118_v17  ;;  %v1131_v18 = vsel %vm1117_vm4, %v1046_v0, %v1037_v11  ;;  %v1073_v43 = vadd.f32 %v1072_v13, %v1071_v6  ;;  %v1082_v41 = vadd.f32 %v1081_v62, %v1080_v28 }
 0x1d4   : > { %v1122_v48 = vsel %vm1121_vm6, %v992_v1, %v1120_v25  ;;  %v1132_v60 = vsel %vm1119_vm5, %v1055_v45, %v1131_v18  ;;  %v1028_v59 = vadd.f32 %v1027_v16, %v2455_v5  ;;  %v1091_v8 = vadd.f32 %v1090_v31, %v1089_v7 }
 0x1d5   : > { %v1124_v61 = vsel %vm1123_vm7, %v1001_v44, %v1122_v48  ;;  %v1133_v42 = vsel %vm1121_vm6, %v1064_v3, %v1132_v60  ;;  %v1100_v34 = vadd.f32 %v1099_v10, %v1098_v54 }
 0x1d6   : > { %v1126_v56 = vsel %vm1125_vm8, %v1010_v19, %v1124_v61  ;;  %v1134_v46 = vsel %vm1123_vm7, %v1073_v43, %v1133_v42 }
 0x1d7   : > { %v1128_v49 = vsel %vm1127_vm9, %v1019_v58, %v1126_v56  ;;  %v1135_v23 = vsel %vm1125_vm8, %v1082_v41, %v1134_v46 }
 0x1d8   : > { %v1130_v36 = vsel %vm1129_vm10, %v1028_v59, %v1128_v49  ;;  %v1136_v51 = vsel %vm1127_vm9, %v1091_v8, %v1135_v23 }
 0x1d9   : > { %v1137_v33 = vsel %vm1129_vm10, %v1100_v34, %v1136_v51  ;;  %1140 = vst [vmem:[%s224_s27] sm:$0xff] %v1130_v36 }
 0x1da   : > { %1141 = vst [vmem:[%s224_s27 + $0x8] sm:$0xff] %v1137_v33 }
 0x1db PF: > { %s15_s18 = sadd.s32 1, %s1298_s18  }
 0x1dc   : > { %p12_p4 = scmp.ge.s32.totalorder %s15_s18, 4  }
 0x1de   :  { %14 = sbr.rel (!%p12_p4) target bundleno = 1 (0x1), region = 70 }

</bundles_post_ra>
